<compile_context>
chip_gen: v7x
topology: tpu7x:2x2x1
jax: 0.10.0
libtpu: 0.0.40
codegen_flags: <defaults>
</compile_context>

<pallas_src>
import jax
import jax.numpy as jnp
from jax.experimental import pallas as pl
from jax.experimental.pallas import tpu as pltpu

# Small, self-consistent problem sizes (dim != dim_out so res_conv is a real 1x1 conv;
# dim_out divisible by groups=8 as GroupNorm requires).
B, H, W = 2, 16, 16
CIN, COUT = 4, 8
GROUPS = 8
TDIM = 8
EPS = 1e-5

WCIN = W * CIN            # 64  (lane width of the input block)
WC = W * COUT             # 128 (lane width of the activation/output block)
CPG = COUT // GROUPS      # 1
INV_GN_COUNT = 1.0 / float(H * W * CPG)


def _mish(x):
    # x * tanh(softplus(x)); logaddexp(x, 0) is a numerically stable softplus.
    return x * jnp.tanh(jnp.logaddexp(x, 0.0))


def _make_kernel(sb):
    """Kernel specialized for `sb` samples per grid step (sb in {1, B})."""

    def kernel(x_ref, temb_ref,
               m1_ref, gl1_ref, bl1_ref,
               mlpw_ref, mlpb_ref,
               m2_ref, gl2_ref, bl2_ref,
               rblk_ref, resbl_ref,
               cgsel_ref, cgselT_ref,
               bsel_ref, bselT_ref,
               out_ref):
        xb = x_ref[...]                                   # (sb*H, W*CIN), lane-dense
        cgsel = cgsel_ref[...]                            # (WC, G)  lane -> group (0/1)
        cgselT = cgselT_ref[...]                          # (G, WC)  group -> lane (0/1)

        def sample_sum(v):                                # per-sample column sums
            if sb == 1:
                return jnp.sum(v, axis=0, keepdims=True)
            return jnp.dot(bsel_ref[...], v, preferred_element_type=jnp.float32)

        def per_row(v):                                   # (sb, WC) -> rows of the block
            if sb == 1:
                return v                                  # plain sublane broadcast
            return jnp.dot(bselT_ref[...], v, preferred_element_type=jnp.float32)

        def conv3x3(a, m_ref):
            # Vertical taps via XLU sublane rolls + batch-aware SAME-padding row mask;
            # horizontal taps + channel mix live in the banded matrices m_ref[d].
            row_in_sample = jax.lax.broadcasted_iota(jnp.int32, a.shape, 0) % H
            out = jnp.dot(a, m_ref[1], preferred_element_type=jnp.float32)      # dy = 0
            up = jnp.where(row_in_sample == 0, 0.0,
                           pltpu.roll(a, shift=1, axis=0))                       # a[y-1]
            out = out + jnp.dot(up, m_ref[0], preferred_element_type=jnp.float32)
            dn = jnp.where(row_in_sample == H - 1, 0.0,
                           pltpu.roll(a, shift=a.shape[0] - 1, axis=0))          # a[y+1]
            out = out + jnp.dot(dn, m_ref[2], preferred_element_type=jnp.float32)
            return out

        def group_norm(h, gl_ref, bl_ref):
            # Fused-selector GroupNorm (per-sample stats, two-pass mean/var).
            mean_g = jnp.dot(sample_sum(h), cgsel,
                             preferred_element_type=jnp.float32) * INV_GN_COUNT  # (sb, G)
            d = h - per_row(jnp.dot(mean_g, cgselT, preferred_element_type=jnp.float32))
            var_g = jnp.dot(sample_sum(d * d), cgsel,
                            preferred_element_type=jnp.float32) * INV_GN_COUNT   # (sb, G)
            scale = jnp.dot(jax.lax.rsqrt(var_g + EPS), gl_ref[...],
                            preferred_element_type=jnp.float32)                  # (sb, WC)
            return d * per_row(scale) + bl_ref[...]

        # --- block1: conv3x3 -> GroupNorm -> Mish (conv bias cancelled by GN mean) ---
        h = _mish(group_norm(conv3x3(xb, m1_ref), gl1_ref, bl1_ref))

        # --- time-embedding MLP (Mish -> Linear), pre-folded to lane space ---
        t_in = temb_ref[0] if sb == 1 else temb_ref[...]                         # (sb, TDIM)
        t_lane = jnp.dot(_mish(t_in), mlpw_ref[...],
                         preferred_element_type=jnp.float32) + mlpb_ref[...]     # (sb, WC)
        h = h + per_row(t_lane)

        # --- block2: conv3x3 -> GroupNorm -> Mish ---
        h = _mish(group_norm(conv3x3(h, m2_ref), gl2_ref, bl2_ref))

        # --- residual 1x1 conv (dim != dim_out): block-diagonal matmul ---
        out_ref[...] = h + jnp.dot(xb, rblk_ref[...],
                                   preferred_element_type=jnp.float32) + resbl_ref[...]

    return kernel


# ------------------------- wrapper: layout plumbing & weight folding -------------------------
def _banded_conv_matrix(w_taps, cin, cout):
    # w_taps: (3, cin, cout) taps for dx = -1, 0, +1 at a fixed dy.
    # Returns M (W*cin, W*cout) with M[w'*cin+ci, w*cout+co] = w_taps[w'-w+1, ci, co]
    # for |w'-w| <= 1 else 0, so (row_shifted_input @ M) = horizontal conv + channel mix.
    wp = jnp.arange(W)[:, None]
    wo = jnp.arange(W)[None, :]
    dx = wp - wo
    valid = (jnp.abs(dx) <= 1).astype(w_taps.dtype)
    tap = jnp.clip(dx + 1, 0, 2)
    m = w_taps[tap] * valid[:, :, None, None]           # (W, W, cin, cout)
    return m.transpose(0, 2, 1, 3).reshape(W * cin, W * cout)


def _default_samples_per_step():
    # v5e/v6e are single-TensorCore: fold the whole batch into one grid step (kills the
    # ~0.35us per-step overhead and doubles MXU row occupancy).  v7x has 2 TCs per chip:
    # keep a parallel grid axis so each core gets a sample.
    try:
        kind = jax.devices()[0].device_kind.lower()
    except Exception:
        kind = ""
    if ("v7" in kind or "7x" in kind) and B % 2 == 0:
        return B // 2
    return B


def resnet_block(x, temb, params, samples_per_step=None):
    # x: (B, H, W, CIN) NHWC; temb: (B, TDIM)
    # The bias-drop / fused-selector shortcut is exact only when every group has a single
    # channel (groups == dim_out); guard it so the config can't silently change.
    assert GROUPS == COUT, "bias-folding / fused-selector path assumes groups == dim_out"

    sb = _default_samples_per_step() if samples_per_step is None else samples_per_step
    assert sb in (1, B) and B % sb == 0
    steps = B // sb
    n_rows = sb * H

    x_flat = x.reshape(B * H, WCIN)

    # 3x3 convs as banded (W*Cin, W*Cout) matrices, one per vertical tap.
    M1 = jnp.stack([_banded_conv_matrix(params["c1w"][d], CIN, COUT) for d in range(3)])
    M2 = jnp.stack([_banded_conv_matrix(params["c2w"][d], COUT, COUT) for d in range(3)])
    # 1x1 residual conv as a block-diagonal matrix.
    Rblk = jnp.kron(jnp.eye(W, dtype=jnp.float32), params["resw"])            # (WCIN, WC)

    # Fused GroupNorm selectors (lane <-> group), gamma folded into the group->lane map.
    gidx = jnp.arange(COUT) // CPG
    Gsel = (gidx[:, None] == jnp.arange(GROUPS)[None, :]).astype(jnp.float32)  # (C, G)
    CGsel = jnp.tile(Gsel, (W, 1))                                             # (WC, G)
    CGselT = CGsel.T                                                           # (G, WC)
    GammaLane1 = CGselT * jnp.tile(params["g1g"], (1, W))                      # (G, WC)
    GammaLane2 = CGselT * jnp.tile(params["g2g"], (1, W))
    beta1_l = jnp.tile(params["g1b"], (1, W))                                  # (1, WC)
    beta2_l = jnp.tile(params["g2b"], (1, W))

    # Time-emb projection folded to lane space.
    CselT = jnp.tile(jnp.eye(COUT, dtype=jnp.float32), (1, W))                 # (C, WC)
    MLPW_lane = params["mlpw"] @ CselT                                         # (TDIM, WC)
    mlpb_l = jnp.tile(params["mlpb"], (1, W))
    resb_l = jnp.tile(params["resb"], (1, W))

    # 0/1 per-sample row selectors (only read by the kernel when sb > 1; tiny either way).
    Bsel = jnp.kron(jnp.eye(sb, dtype=jnp.float32), jnp.ones((1, H), jnp.float32))
    BselT = Bsel.T

    if sb == 1:
        temb_arg = temb.reshape(B, 1, TDIM)
        temb_spec = pl.BlockSpec((1, 1, TDIM), lambda b: (b, 0, 0))
    else:
        temb_arg = temb
        temb_spec = pl.BlockSpec((B, TDIM), lambda b: (0, 0))

    inv2 = lambda shape: pl.BlockSpec(shape, lambda b: (0, 0))
    inv3 = lambda shape: pl.BlockSpec(shape, lambda b: (0, 0, 0))

    out = pl.pallas_call(
        _make_kernel(sb),
        out_shape=jax.ShapeDtypeStruct((B * H, WC), jnp.float32),
        grid=(steps,),
        in_specs=[
            pl.BlockSpec((n_rows, WCIN), lambda b: (b, 0)),    # x_flat (per-step rows)
            temb_spec,                                         # temb
            inv3((3, WCIN, WC)),                               # M1 (banded conv1)
            inv2((GROUPS, WC)),                                # GammaLane1
            inv2((1, WC)),                                     # beta1 (lane-tiled)
            inv2((TDIM, WC)),                                  # MLPW_lane
            inv2((1, WC)),                                     # mlp bias (lane-tiled)
            inv3((3, WC, WC)),                                 # M2 (banded conv2)
            inv2((GROUPS, WC)),                                # GammaLane2
            inv2((1, WC)),                                     # beta2 (lane-tiled)
            inv2((WCIN, WC)),                                  # residual 1x1 (block-diag)
            inv2((1, WC)),                                     # residual bias (lane-tiled)
            inv2((WC, GROUPS)),                                # CGsel
            inv2((GROUPS, WC)),                                # CGselT
            inv2((sb, n_rows)),                                # Bsel
            inv2((n_rows, sb)),                                # BselT
        ],
        out_specs=pl.BlockSpec((n_rows, WC), lambda b: (b, 0)),
        compiler_params=pltpu.CompilerParams(
            dimension_semantics=("parallel",)),
    )(x_flat, temb_arg, M1, GammaLane1, beta1_l, MLPW_lane, mlpb_l,
      M2, GammaLane2, beta2_l, Rblk, resb_l, CGsel, CGselT, Bsel, BselT)
    return out.reshape(B, H, W, COUT)


# ------------------------- pure-JAX reference (for validation) -------------------------
def ref_forward(x, temb, p):
    def conv3x3(inp, w, b):
        y = jax.lax.conv_general_dilated(
            inp, w, window_strides=(1, 1), padding="SAME",
            dimension_numbers=("NHWC", "HWIO", "NHWC"))
        return y + b.reshape(1, 1, 1, -1)

    def gn(h, gamma, beta):
        b, hh, ww, c = h.shape
        hg = h.reshape(b, hh * ww, GROUPS, c // GROUPS)
        mean = hg.mean(axis=(1, 3), keepdims=True)
        var = ((hg - mean) ** 2).mean(axis=(1, 3), keepdims=True)
        hn = (hg - mean) * jax.lax.rsqrt(var + EPS)
        return hn.reshape(b, hh, ww, c) * gamma.reshape(1, 1, 1, -1) + beta.reshape(1, 1, 1, -1)

    def mish(v):
        return v * jnp.tanh(jnp.logaddexp(v, 0.0))

    h = mish(gn(conv3x3(x, p["c1w"], p["c1b"]), p["g1g"], p["g1b"]))
    t = mish(temb) @ p["mlpw"] + p["mlpb"]
    h = h + t[:, None, None, :]
    h = mish(gn(conv3x3(h, p["c2w"], p["c2b"]), p["g2g"], p["g2b"]))
    res = x.reshape(-1, CIN) @ p["resw"] + p["resb"]
    return h + res.reshape(B, H, W, COUT)


def make_params(key):
    ks = jax.random.split(key, 12)

    def nrm(k, shape, scale):
        return (scale * jax.random.normal(k, shape)).astype(jnp.float32)

    return dict(
        c1w=nrm(ks[0], (3, 3, CIN, COUT), 0.2),
        c1b=nrm(ks[1], (1, COUT), 0.1),
        g1g=(1.0 + 0.1 * jax.random.normal(ks[2], (1, COUT))).astype(jnp.float32),
        g1b=nrm(ks[3], (1, COUT), 0.1),
        mlpw=nrm(ks[4], (TDIM, COUT), 0.2),
        mlpb=nrm(ks[5], (1, COUT), 0.1),
        c2w=nrm(ks[6], (3, 3, COUT, COUT), 0.2),
        c2b=nrm(ks[7], (1, COUT), 0.1),
        g2g=(1.0 + 0.1 * jax.random.normal(ks[8], (1, COUT))).astype(jnp.float32),
        g2b=nrm(ks[9], (1, COUT), 0.1),
        resw=nrm(ks[10], (CIN, COUT), 0.3),
        resb=nrm(ks[11], (1, COUT), 0.1),
    )


if __name__ == "__main__":
    key = jax.random.PRNGKey(0)
    kx, kt, kp = jax.random.split(key, 3)
    # PyTorch input would be NCHW (2, 4, 16, 16); kernel carries NHWC (2, 16, 16, 4).
    x = jax.random.normal(kx, (B, H, W, CIN), jnp.float32)
    temb = jax.random.normal(kt, (B, TDIM), jnp.float32)
    params = make_params(kp)

    out = jax.block_until_ready(resnet_block(x, temb, params))
    ref = jax.block_until_ready(ref_forward(x, temb, params))

    assert out.shape == (B, H, W, COUT)
    assert bool(jnp.all(jnp.isfinite(out)))
    max_diff = float(jnp.max(jnp.abs(out - ref)))
    # Both sides (kernel MXU matmuls and XLA's reference conv) run at default reduced f32
    # precision on the MXU, so a sub-1e-3 tolerance would need Precision.HIGHEST on both.
    assert jnp.allclose(out, ref, atol=2e-2, rtol=2e-2), f"max abs diff {max_diff}"
    print("KERNEL_OK")
</pallas_src>

<mosaic_0001>
module attributes {stable_mosaic.version = 11 : i64} {
  func.func @kernel(%arg0: i32, %arg1: memref<32x64xf32, #tpu.memory_space<vmem>>, %arg2: memref<2x8xf32, #tpu.memory_space<vmem>>, %arg3: memref<3x64x128xf32, #tpu.memory_space<vmem>>, %arg4: memref<8x128xf32, #tpu.memory_space<vmem>>, %arg5: memref<1x128xf32, #tpu.memory_space<vmem>>, %arg6: memref<8x128xf32, #tpu.memory_space<vmem>>, %arg7: memref<1x128xf32, #tpu.memory_space<vmem>>, %arg8: memref<3x128x128xf32, #tpu.memory_space<vmem>>, %arg9: memref<8x128xf32, #tpu.memory_space<vmem>>, %arg10: memref<1x128xf32, #tpu.memory_space<vmem>>, %arg11: memref<64x128xf32, #tpu.memory_space<vmem>>, %arg12: memref<1x128xf32, #tpu.memory_space<vmem>>, %arg13: memref<128x8xf32, #tpu.memory_space<vmem>>, %arg14: memref<8x128xf32, #tpu.memory_space<vmem>>, %arg15: memref<2x32xf32, #tpu.memory_space<vmem>>, %arg16: memref<32x2xf32, #tpu.memory_space<vmem>>, %arg17: memref<32x128xf32, #tpu.memory_space<vmem>>) attributes {dimension_semantics = [#tpu.dimension_semantics<parallel>], iteration_bounds = array<i64: 1>, scalar_prefetch = 0 : i64, scratch_operands = 0 : i64, tpu.core_type = #tpu.core_type<tc>, window_params = [{transform_indices = @transform_0, window_bounds = array<i64: 32, 64>}, {pipeline_mode = #tpu.pipeline_mode<synchronous>, transform_indices = @transform_1, window_bounds = array<i64: 2, 8>}, {pipeline_mode = #tpu.pipeline_mode<synchronous>, transform_indices = @transform_2, window_bounds = array<i64: 3, 64, 128>}, {pipeline_mode = #tpu.pipeline_mode<synchronous>, transform_indices = @transform_3, window_bounds = array<i64: 8, 128>}, {pipeline_mode = #tpu.pipeline_mode<synchronous>, transform_indices = @transform_4, window_bounds = array<i64: 1, 128>}, {pipeline_mode = #tpu.pipeline_mode<synchronous>, transform_indices = @transform_5, window_bounds = array<i64: 8, 128>}, {pipeline_mode = #tpu.pipeline_mode<synchronous>, transform_indices = @transform_6, window_bounds = array<i64: 1, 128>}, {pipeline_mode = #tpu.pipeline_mode<synchronous>, transform_indices = @transform_7, window_bounds = array<i64: 3, 128, 128>}, {pipeline_mode = #tpu.pipeline_mode<synchronous>, transform_indices = @transform_8, window_bounds = array<i64: 8, 128>}, {pipeline_mode = #tpu.pipeline_mode<synchronous>, transform_indices = @transform_9, window_bounds = array<i64: 1, 128>}, {pipeline_mode = #tpu.pipeline_mode<synchronous>, transform_indices = @transform_10, window_bounds = array<i64: 64, 128>}, {pipeline_mode = #tpu.pipeline_mode<synchronous>, transform_indices = @transform_11, window_bounds = array<i64: 1, 128>}, {pipeline_mode = #tpu.pipeline_mode<synchronous>, transform_indices = @transform_12, window_bounds = array<i64: 128, 8>}, {pipeline_mode = #tpu.pipeline_mode<synchronous>, transform_indices = @transform_13, window_bounds = array<i64: 8, 128>}, {pipeline_mode = #tpu.pipeline_mode<synchronous>, transform_indices = @transform_14, window_bounds = array<i64: 2, 32>}, {pipeline_mode = #tpu.pipeline_mode<synchronous>, transform_indices = @transform_15, window_bounds = array<i64: 32, 2>}, {transform_indices = @transform_16, window_bounds = array<i64: 32, 128>}]} {
    %c0 = arith.constant 0 : index
    %c0_0 = arith.constant 0 : index
    %0 = vector.load %arg1[%c0, %c0_0] : memref<32x64xf32, #tpu.memory_space<vmem>>, vector<32x64xf32>
    %c0_1 = arith.constant 0 : index
    %c0_2 = arith.constant 0 : index
    %1 = vector.load %arg13[%c0_1, %c0_2] : memref<128x8xf32, #tpu.memory_space<vmem>>, vector<128x8xf32>
    %c0_3 = arith.constant 0 : index
    %c0_4 = arith.constant 0 : index
    %2 = vector.load %arg14[%c0_3, %c0_4] : memref<8x128xf32, #tpu.memory_space<vmem>>, vector<8x128xf32>
    %3 = tpu.iota {dimensions = array<i32: 0>} : vector<32x64xi32>
    %c16_i32 = arith.constant 16 : i32
    %c0_i32 = arith.constant 0 : i32
    %4 = arith.cmpi eq, %c16_i32, %c0_i32 : i32
    %c1_i32 = arith.constant 1 : i32
    %5 = arith.select %4, %c1_i32, %c16_i32 : i32
    %6 = vector.broadcast %5 : i32 to vector<32x64xi32>
    %7 = arith.remsi %3, %6 : vector<32x64xi32>
    %c0_i32_5 = arith.constant 0 : i32
    %8 = vector.broadcast %c0_i32_5 : i32 to vector<32x64xi32>
    %9 = arith.cmpi ne, %7, %8 : vector<32x64xi32>
    %c0_i32_6 = arith.constant 0 : i32
    %10 = vector.broadcast %c0_i32_6 : i32 to vector<32x64xi32>
    %11 = arith.cmpi slt, %7, %10 : vector<32x64xi32>
    %c0_i32_7 = arith.constant 0 : i32
    %12 = arith.cmpi slt, %5, %c0_i32_7 : i32
    %13 = vector.broadcast %12 : i1 to vector<32x64xi1>
    %14 = vector.broadcast %13 : vector<32x64xi1> to vector<32x64xi1>
    %15 = arith.xori %11, %14 : vector<32x64xi1>
    %16 = arith.andi %15, %9 : vector<32x64xi1>
    %17 = vector.broadcast %5 : i32 to vector<32x64xi32>
    %18 = arith.addi %7, %17 : vector<32x64xi32>
    %19 = arith.select %16, %18, %7 : vector<32x64xi1>, vector<32x64xi32>
    %c1 = arith.constant 1 : index
    %c0_8 = arith.constant 0 : index
    %c0_9 = arith.constant 0 : index
    %20 = vector.load %arg3[%c1, %c0_8, %c0_9] : memref<3x64x128xf32, #tpu.memory_space<vmem>>, vector<1x64x128xf32>
    %21 = vector.shape_cast %20 : vector<1x64x128xf32> to vector<64x128xf32>
    %cst = arith.constant dense<0.000000e+00> : vector<32x128xf32>
    %22 = tpu.matmul %0, %21, %cst {dimension_numbers = #tpu.dot_dimension_numbers<[1], [0], [0], [1], [0, 0, 1, 1], [], []>} : vector<32x64xf32>, vector<64x128xf32>, vector<32x128xf32> -> vector<32x128xf32>
    %c0_i32_10 = arith.constant 0 : i32
    %23 = vector.broadcast %c0_i32_10 : i32 to vector<32x64xi32>
    %24 = arith.cmpi eq, %19, %23 : vector<32x64xi32>
    %c1_i32_11 = arith.constant 1 : i32
    %25 = tpu.dynamic_rotate %0 by %c1_i32_11 dim 0 : vector<32x64xf32>, i32 -> vector<32x64xf32>
    %cst_12 = arith.constant 0.000000e+00 : f32
    %26 = vector.broadcast %cst_12 : f32 to vector<32x64xf32>
    %27 = arith.select %24, %26, %25 : vector<32x64xi1>, vector<32x64xf32>
    %c0_13 = arith.constant 0 : index
    %c0_14 = arith.constant 0 : index
    %c0_15 = arith.constant 0 : index
    %28 = vector.load %arg3[%c0_13, %c0_14, %c0_15] : memref<3x64x128xf32, #tpu.memory_space<vmem>>, vector<1x64x128xf32>
    %29 = vector.shape_cast %28 : vector<1x64x128xf32> to vector<64x128xf32>
    %cst_16 = arith.constant dense<0.000000e+00> : vector<32x128xf32>
    %30 = tpu.matmul %27, %29, %cst_16 {dimension_numbers = #tpu.dot_dimension_numbers<[1], [0], [0], [1], [0, 0, 1, 1], [], []>} : vector<32x64xf32>, vector<64x128xf32>, vector<32x128xf32> -> vector<32x128xf32>
    %31 = arith.addf %22, %30 : vector<32x128xf32>
    %c15_i32 = arith.constant 15 : i32
    %32 = vector.broadcast %c15_i32 : i32 to vector<32x64xi32>
    %33 = arith.cmpi eq, %19, %32 : vector<32x64xi32>
    %c31_i32 = arith.constant 31 : i32
    %34 = tpu.dynamic_rotate %0 by %c31_i32 dim 0 : vector<32x64xf32>, i32 -> vector<32x64xf32>
    %cst_17 = arith.constant 0.000000e+00 : f32
    %35 = vector.broadcast %cst_17 : f32 to vector<32x64xf32>
    %36 = arith.select %33, %35, %34 : vector<32x64xi1>, vector<32x64xf32>
    %c2 = arith.constant 2 : index
    %c0_18 = arith.constant 0 : index
    %c0_19 = arith.constant 0 : index
    %37 = vector.load %arg3[%c2, %c0_18, %c0_19] : memref<3x64x128xf32, #tpu.memory_space<vmem>>, vector<1x64x128xf32>
    %38 = vector.shape_cast %37 : vector<1x64x128xf32> to vector<64x128xf32>
    %cst_20 = arith.constant dense<0.000000e+00> : vector<32x128xf32>
    %39 = tpu.matmul %36, %38, %cst_20 {dimension_numbers = #tpu.dot_dimension_numbers<[1], [0], [0], [1], [0, 0, 1, 1], [], []>} : vector<32x64xf32>, vector<64x128xf32>, vector<32x128xf32> -> vector<32x128xf32>
    %40 = arith.addf %31, %39 : vector<32x128xf32>
    %c0_21 = arith.constant 0 : index
    %c0_22 = arith.constant 0 : index
    %41 = vector.load %arg15[%c0_21, %c0_22] : memref<2x32xf32, #tpu.memory_space<vmem>>, vector<2x32xf32>
    %cst_23 = arith.constant dense<0.000000e+00> : vector<2x128xf32>
    %42 = tpu.matmul %41, %40, %cst_23 {dimension_numbers = #tpu.dot_dimension_numbers<[1], [0], [0], [1], [0, 0, 1, 1], [], []>} : vector<2x32xf32>, vector<32x128xf32>, vector<2x128xf32> -> vector<2x128xf32>
    %cst_24 = arith.constant dense<0.000000e+00> : vector<2x8xf32>
    %43 = tpu.matmul %42, %1, %cst_24 {dimension_numbers = #tpu.dot_dimension_numbers<[1], [0], [0], [1], [0, 0, 1, 1], [], []>} : vector<2x128xf32>, vector<128x8xf32>, vector<2x8xf32> -> vector<2x8xf32>
    %cst_25 = arith.constant 3.906250e-03 : f32
    %44 = vector.broadcast %cst_25 : f32 to vector<2x8xf32>
    %45 = arith.mulf %43, %44 : vector<2x8xf32>
    %cst_26 = arith.constant dense<0.000000e+00> : vector<2x128xf32>
    %46 = tpu.matmul %45, %2, %cst_26 {dimension_numbers = #tpu.dot_dimension_numbers<[1], [0], [0], [1], [0, 0, 1, 1], [], []>} : vector<2x8xf32>, vector<8x128xf32>, vector<2x128xf32> -> vector<2x128xf32>
    %c0_27 = arith.constant 0 : index
    %c0_28 = arith.constant 0 : index
    %47 = vector.load %arg16[%c0_27, %c0_28] : memref<32x2xf32, #tpu.memory_space<vmem>>, vector<32x2xf32>
    %cst_29 = arith.constant dense<0.000000e+00> : vector<32x128xf32>
    %48 = tpu.matmul %47, %46, %cst_29 {dimension_numbers = #tpu.dot_dimension_numbers<[1], [0], [0], [1], [0, 0, 1, 1], [], []>} : vector<32x2xf32>, vector<2x128xf32>, vector<32x128xf32> -> vector<32x128xf32>
    %49 = arith.subf %40, %48 : vector<32x128xf32>
    %50 = arith.mulf %49, %49 : vector<32x128xf32>
    %c0_30 = arith.constant 0 : index
    %c0_31 = arith.constant 0 : index
    %51 = vector.load %arg15[%c0_30, %c0_31] : memref<2x32xf32, #tpu.memory_space<vmem>>, vector<2x32xf32>
    %cst_32 = arith.constant dense<0.000000e+00> : vector<2x128xf32>
    %52 = tpu.matmul %51, %50, %cst_32 {dimension_numbers = #tpu.dot_dimension_numbers<[1], [0], [0], [1], [0, 0, 1, 1], [], []>} : vector<2x32xf32>, vector<32x128xf32>, vector<2x128xf32> -> vector<2x128xf32>
    %cst_33 = arith.constant dense<0.000000e+00> : vector<2x8xf32>
    %53 = tpu.matmul %52, %1, %cst_33 {dimension_numbers = #tpu.dot_dimension_numbers<[1], [0], [0], [1], [0, 0, 1, 1], [], []>} : vector<2x128xf32>, vector<128x8xf32>, vector<2x8xf32> -> vector<2x8xf32>
    %cst_34 = arith.constant 3.906250e-03 : f32
    %54 = vector.broadcast %cst_34 : f32 to vector<2x8xf32>
    %55 = arith.mulf %53, %54 : vector<2x8xf32>
    %cst_35 = arith.constant 9.99999974E-6 : f32
    %56 = vector.broadcast %cst_35 : f32 to vector<2x8xf32>
    %57 = arith.addf %55, %56 : vector<2x8xf32>
    %58 = math.rsqrt %57 : vector<2x8xf32>
    %c0_36 = arith.constant 0 : index
    %c0_37 = arith.constant 0 : index
    %59 = vector.load %arg4[%c0_36, %c0_37] : memref<8x128xf32, #tpu.memory_space<vmem>>, vector<8x128xf32>
    %cst_38 = arith.constant dense<0.000000e+00> : vector<2x128xf32>
    %60 = tpu.matmul %58, %59, %cst_38 {dimension_numbers = #tpu.dot_dimension_numbers<[1], [0], [0], [1], [0, 0, 1, 1], [], []>} : vector<2x8xf32>, vector<8x128xf32>, vector<2x128xf32> -> vector<2x128xf32>
    %c0_39 = arith.constant 0 : index
    %c0_40 = arith.constant 0 : index
    %61 = vector.load %arg16[%c0_39, %c0_40] : memref<32x2xf32, #tpu.memory_space<vmem>>, vector<32x2xf32>
    %cst_41 = arith.constant dense<0.000000e+00> : vector<32x128xf32>
    %62 = tpu.matmul %61, %60, %cst_41 {dimension_numbers = #tpu.dot_dimension_numbers<[1], [0], [0], [1], [0, 0, 1, 1], [], []>} : vector<32x2xf32>, vector<2x128xf32>, vector<32x128xf32> -> vector<32x128xf32>
    %63 = arith.mulf %49, %62 : vector<32x128xf32>
    %c0_42 = arith.constant 0 : index
    %c0_43 = arith.constant 0 : index
    %64 = vector.load %arg5[%c0_42, %c0_43] : memref<1x128xf32, #tpu.memory_space<vmem>>, vector<1x128xf32>
    %65 = vector.broadcast %64 : vector<1x128xf32> to vector<32x128xf32>
    %66 = arith.addf %63, %65 : vector<32x128xf32>
    %cst_44 = arith.constant 0.000000e+00 : f32
    %67 = vector.broadcast %cst_44 : f32 to vector<32x128xf32>
    %68 = arith.maximumf %66, %67 : vector<32x128xf32>
    %69 = vector.broadcast %cst_44 : f32 to vector<32x128xf32>
    %70 = arith.subf %66, %69 : vector<32x128xf32>
    %71 = arith.cmpf one, %70, %70 : vector<32x128xf32>
    %72 = vector.broadcast %cst_44 : f32 to vector<32x128xf32>
    %73 = arith.addf %66, %72 : vector<32x128xf32>
    %74 = math.absf %70 : vector<32x128xf32>
    %cst_45 = arith.constant 0.000000e+00 : f32
    %75 = vector.broadcast %cst_45 : f32 to vector<32x128xf32>
    %76 = arith.subf %75, %74 : vector<32x128xf32>
    %77 = math.exp %76 : vector<32x128xf32>
    %78 = math.log1p %77 : vector<32x128xf32>
    %79 = arith.addf %68, %78 : vector<32x128xf32>
    %80 = arith.select %71, %73, %79 : vector<32x128xi1>, vector<32x128xf32>
    %81 = math.tanh %80 : vector<32x128xf32>
    %82 = arith.mulf %66, %81 : vector<32x128xf32>
    %c0_46 = arith.constant 0 : index
    %c0_47 = arith.constant 0 : index
    %83 = vector.load %arg2[%c0_46, %c0_47] : memref<2x8xf32, #tpu.memory_space<vmem>>, vector<2x8xf32>
    %cst_48 = arith.constant 0.000000e+00 : f32
    %84 = vector.broadcast %cst_48 : f32 to vector<2x8xf32>
    %85 = arith.maximumf %83, %84 : vector<2x8xf32>
    %86 = vector.broadcast %cst_48 : f32 to vector<2x8xf32>
    %87 = arith.subf %83, %86 : vector<2x8xf32>
    %88 = arith.cmpf one, %87, %87 : vector<2x8xf32>
    %89 = vector.broadcast %cst_48 : f32 to vector<2x8xf32>
    %90 = arith.addf %83, %89 : vector<2x8xf32>
    %91 = math.absf %87 : vector<2x8xf32>
    %cst_49 = arith.constant 0.000000e+00 : f32
    %92 = vector.broadcast %cst_49 : f32 to vector<2x8xf32>
    %93 = arith.subf %92, %91 : vector<2x8xf32>
    %94 = math.exp %93 : vector<2x8xf32>
    %95 = math.log1p %94 : vector<2x8xf32>
    %96 = arith.addf %85, %95 : vector<2x8xf32>
    %97 = arith.select %88, %90, %96 : vector<2x8xi1>, vector<2x8xf32>
    %98 = math.tanh %97 : vector<2x8xf32>
    %99 = arith.mulf %83, %98 : vector<2x8xf32>
    %c0_50 = arith.constant 0 : index
    %c0_51 = arith.constant 0 : index
    %100 = vector.load %arg6[%c0_50, %c0_51] : memref<8x128xf32, #tpu.memory_space<vmem>>, vector<8x128xf32>
    %cst_52 = arith.constant dense<0.000000e+00> : vector<2x128xf32>
    %101 = tpu.matmul %99, %100, %cst_52 {dimension_numbers = #tpu.dot_dimension_numbers<[1], [0], [0], [1], [0, 0, 1, 1], [], []>} : vector<2x8xf32>, vector<8x128xf32>, vector<2x128xf32> -> vector<2x128xf32>
    %c0_53 = arith.constant 0 : index
    %c0_54 = arith.constant 0 : index
    %102 = vector.load %arg7[%c0_53, %c0_54] : memref<1x128xf32, #tpu.memory_space<vmem>>, vector<1x128xf32>
    %103 = vector.broadcast %102 : vector<1x128xf32> to vector<2x128xf32>
    %104 = arith.addf %101, %103 : vector<2x128xf32>
    %c0_55 = arith.constant 0 : index
    %c0_56 = arith.constant 0 : index
    %105 = vector.load %arg16[%c0_55, %c0_56] : memref<32x2xf32, #tpu.memory_space<vmem>>, vector<32x2xf32>
    %cst_57 = arith.constant dense<0.000000e+00> : vector<32x128xf32>
    %106 = tpu.matmul %105, %104, %cst_57 {dimension_numbers = #tpu.dot_dimension_numbers<[1], [0], [0], [1], [0, 0, 1, 1], [], []>} : vector<32x2xf32>, vector<2x128xf32>, vector<32x128xf32> -> vector<32x128xf32>
    %107 = arith.addf %82, %106 : vector<32x128xf32>
    %108 = tpu.iota {dimensions = array<i32: 0>} : vector<32x128xi32>
    %c16_i32_58 = arith.constant 16 : i32
    %c0_i32_59 = arith.constant 0 : i32
    %109 = arith.cmpi eq, %c16_i32_58, %c0_i32_59 : i32
    %c1_i32_60 = arith.constant 1 : i32
    %110 = arith.select %109, %c1_i32_60, %c16_i32_58 : i32
    %111 = vector.broadcast %110 : i32 to vector<32x128xi32>
    %112 = arith.remsi %108, %111 : vector<32x128xi32>
    %c0_i32_61 = arith.constant 0 : i32
    %113 = vector.broadcast %c0_i32_61 : i32 to vector<32x128xi32>
    %114 = arith.cmpi ne, %112, %113 : vector<32x128xi32>
    %c0_i32_62 = arith.constant 0 : i32
    %115 = vector.broadcast %c0_i32_62 : i32 to vector<32x128xi32>
    %116 = arith.cmpi slt, %112, %115 : vector<32x128xi32>
    %c0_i32_63 = arith.constant 0 : i32
    %117 = arith.cmpi slt, %110, %c0_i32_63 : i32
    %118 = vector.broadcast %117 : i1 to vector<32x128xi1>
    %119 = vector.broadcast %118 : vector<32x128xi1> to vector<32x128xi1>
    %120 = arith.xori %116, %119 : vector<32x128xi1>
    %121 = arith.andi %120, %114 : vector<32x128xi1>
    %122 = vector.broadcast %110 : i32 to vector<32x128xi32>
    %123 = arith.addi %112, %122 : vector<32x128xi32>
    %124 = arith.select %121, %123, %112 : vector<32x128xi1>, vector<32x128xi32>
    %c1_64 = arith.constant 1 : index
    %c0_65 = arith.constant 0 : index
    %c0_66 = arith.constant 0 : index
    %125 = vector.load %arg8[%c1_64, %c0_65, %c0_66] : memref<3x128x128xf32, #tpu.memory_space<vmem>>, vector<1x128x128xf32>
    %126 = vector.shape_cast %125 : vector<1x128x128xf32> to vector<128x128xf32>
    %cst_67 = arith.constant dense<0.000000e+00> : vector<32x128xf32>
    %127 = tpu.matmul %107, %126, %cst_67 {dimension_numbers = #tpu.dot_dimension_numbers<[1], [0], [0], [1], [0, 0, 1, 1], [], []>} : vector<32x128xf32>, vector<128x128xf32>, vector<32x128xf32> -> vector<32x128xf32>
    %c0_i32_68 = arith.constant 0 : i32
    %128 = vector.broadcast %c0_i32_68 : i32 to vector<32x128xi32>
    %129 = arith.cmpi eq, %124, %128 : vector<32x128xi32>
    %c1_i32_69 = arith.constant 1 : i32
    %130 = tpu.dynamic_rotate %107 by %c1_i32_69 dim 0 : vector<32x128xf32>, i32 -> vector<32x128xf32>
    %cst_70 = arith.constant 0.000000e+00 : f32
    %131 = vector.broadcast %cst_70 : f32 to vector<32x128xf32>
    %132 = arith.select %129, %131, %130 : vector<32x128xi1>, vector<32x128xf32>
    %c0_71 = arith.constant 0 : index
    %c0_72 = arith.constant 0 : index
    %c0_73 = arith.constant 0 : index
    %133 = vector.load %arg8[%c0_71, %c0_72, %c0_73] : memref<3x128x128xf32, #tpu.memory_space<vmem>>, vector<1x128x128xf32>
    %134 = vector.shape_cast %133 : vector<1x128x128xf32> to vector<128x128xf32>
    %cst_74 = arith.constant dense<0.000000e+00> : vector<32x128xf32>
    %135 = tpu.matmul %132, %134, %cst_74 {dimension_numbers = #tpu.dot_dimension_numbers<[1], [0], [0], [1], [0, 0, 1, 1], [], []>} : vector<32x128xf32>, vector<128x128xf32>, vector<32x128xf32> -> vector<32x128xf32>
    %136 = arith.addf %127, %135 : vector<32x128xf32>
    %c15_i32_75 = arith.constant 15 : i32
    %137 = vector.broadcast %c15_i32_75 : i32 to vector<32x128xi32>
    %138 = arith.cmpi eq, %124, %137 : vector<32x128xi32>
    %c31_i32_76 = arith.constant 31 : i32
    %139 = tpu.dynamic_rotate %107 by %c31_i32_76 dim 0 : vector<32x128xf32>, i32 -> vector<32x128xf32>
    %cst_77 = arith.constant 0.000000e+00 : f32
    %140 = vector.broadcast %cst_77 : f32 to vector<32x128xf32>
    %141 = arith.select %138, %140, %139 : vector<32x128xi1>, vector<32x128xf32>
    %c2_78 = arith.constant 2 : index
    %c0_79 = arith.constant 0 : index
    %c0_80 = arith.constant 0 : index
    %142 = vector.load %arg8[%c2_78, %c0_79, %c0_80] : memref<3x128x128xf32, #tpu.memory_space<vmem>>, vector<1x128x128xf32>
    %143 = vector.shape_cast %142 : vector<1x128x128xf32> to vector<128x128xf32>
    %cst_81 = arith.constant dense<0.000000e+00> : vector<32x128xf32>
    %144 = tpu.matmul %141, %143, %cst_81 {dimension_numbers = #tpu.dot_dimension_numbers<[1], [0], [0], [1], [0, 0, 1, 1], [], []>} : vector<32x128xf32>, vector<128x128xf32>, vector<32x128xf32> -> vector<32x128xf32>
    %145 = arith.addf %136, %144 : vector<32x128xf32>
    %c0_82 = arith.constant 0 : index
    %c0_83 = arith.constant 0 : index
    %146 = vector.load %arg15[%c0_82, %c0_83] : memref<2x32xf32, #tpu.memory_space<vmem>>, vector<2x32xf32>
    %cst_84 = arith.constant dense<0.000000e+00> : vector<2x128xf32>
    %147 = tpu.matmul %146, %145, %cst_84 {dimension_numbers = #tpu.dot_dimension_numbers<[1], [0], [0], [1], [0, 0, 1, 1], [], []>} : vector<2x32xf32>, vector<32x128xf32>, vector<2x128xf32> -> vector<2x128xf32>
    %cst_85 = arith.constant dense<0.000000e+00> : vector<2x8xf32>
    %148 = tpu.matmul %147, %1, %cst_85 {dimension_numbers = #tpu.dot_dimension_numbers<[1], [0], [0], [1], [0, 0, 1, 1], [], []>} : vector<2x128xf32>, vector<128x8xf32>, vector<2x8xf32> -> vector<2x8xf32>
    %cst_86 = arith.constant 3.906250e-03 : f32
    %149 = vector.broadcast %cst_86 : f32 to vector<2x8xf32>
    %150 = arith.mulf %148, %149 : vector<2x8xf32>
    %cst_87 = arith.constant dense<0.000000e+00> : vector<2x128xf32>
    %151 = tpu.matmul %150, %2, %cst_87 {dimension_numbers = #tpu.dot_dimension_numbers<[1], [0], [0], [1], [0, 0, 1, 1], [], []>} : vector<2x8xf32>, vector<8x128xf32>, vector<2x128xf32> -> vector<2x128xf32>
    %c0_88 = arith.constant 0 : index
    %c0_89 = arith.constant 0 : index
    %152 = vector.load %arg16[%c0_88, %c0_89] : memref<32x2xf32, #tpu.memory_space<vmem>>, vector<32x2xf32>
    %cst_90 = arith.constant dense<0.000000e+00> : vector<32x128xf32>
    %153 = tpu.matmul %152, %151, %cst_90 {dimension_numbers = #tpu.dot_dimension_numbers<[1], [0], [0], [1], [0, 0, 1, 1], [], []>} : vector<32x2xf32>, vector<2x128xf32>, vector<32x128xf32> -> vector<32x128xf32>
    %154 = arith.subf %145, %153 : vector<32x128xf32>
    %155 = arith.mulf %154, %154 : vector<32x128xf32>
    %c0_91 = arith.constant 0 : index
    %c0_92 = arith.constant 0 : index
    %156 = vector.load %arg15[%c0_91, %c0_92] : memref<2x32xf32, #tpu.memory_space<vmem>>, vector<2x32xf32>
    %cst_93 = arith.constant dense<0.000000e+00> : vector<2x128xf32>
    %157 = tpu.matmul %156, %155, %cst_93 {dimension_numbers = #tpu.dot_dimension_numbers<[1], [0], [0], [1], [0, 0, 1, 1], [], []>} : vector<2x32xf32>, vector<32x128xf32>, vector<2x128xf32> -> vector<2x128xf32>
    %cst_94 = arith.constant dense<0.000000e+00> : vector<2x8xf32>
    %158 = tpu.matmul %157, %1, %cst_94 {dimension_numbers = #tpu.dot_dimension_numbers<[1], [0], [0], [1], [0, 0, 1, 1], [], []>} : vector<2x128xf32>, vector<128x8xf32>, vector<2x8xf32> -> vector<2x8xf32>
    %cst_95 = arith.constant 3.906250e-03 : f32
    %159 = vector.broadcast %cst_95 : f32 to vector<2x8xf32>
    %160 = arith.mulf %158, %159 : vector<2x8xf32>
    %cst_96 = arith.constant 9.99999974E-6 : f32
    %161 = vector.broadcast %cst_96 : f32 to vector<2x8xf32>
    %162 = arith.addf %160, %161 : vector<2x8xf32>
    %163 = math.rsqrt %162 : vector<2x8xf32>
    %c0_97 = arith.constant 0 : index
    %c0_98 = arith.constant 0 : index
    %164 = vector.load %arg9[%c0_97, %c0_98] : memref<8x128xf32, #tpu.memory_space<vmem>>, vector<8x128xf32>
    %cst_99 = arith.constant dense<0.000000e+00> : vector<2x128xf32>
    %165 = tpu.matmul %163, %164, %cst_99 {dimension_numbers = #tpu.dot_dimension_numbers<[1], [0], [0], [1], [0, 0, 1, 1], [], []>} : vector<2x8xf32>, vector<8x128xf32>, vector<2x128xf32> -> vector<2x128xf32>
    %c0_100 = arith.constant 0 : index
    %c0_101 = arith.constant 0 : index
    %166 = vector.load %arg16[%c0_100, %c0_101] : memref<32x2xf32, #tpu.memory_space<vmem>>, vector<32x2xf32>
    %cst_102 = arith.constant dense<0.000000e+00> : vector<32x128xf32>
    %167 = tpu.matmul %166, %165, %cst_102 {dimension_numbers = #tpu.dot_dimension_numbers<[1], [0], [0], [1], [0, 0, 1, 1], [], []>} : vector<32x2xf32>, vector<2x128xf32>, vector<32x128xf32> -> vector<32x128xf32>
    %168 = arith.mulf %154, %167 : vector<32x128xf32>
    %c0_103 = arith.constant 0 : index
    %c0_104 = arith.constant 0 : index
    %169 = vector.load %arg10[%c0_103, %c0_104] : memref<1x128xf32, #tpu.memory_space<vmem>>, vector<1x128xf32>
    %170 = vector.broadcast %169 : vector<1x128xf32> to vector<32x128xf32>
    %171 = arith.addf %168, %170 : vector<32x128xf32>
    %cst_105 = arith.constant 0.000000e+00 : f32
    %172 = vector.broadcast %cst_105 : f32 to vector<32x128xf32>
    %173 = arith.maximumf %171, %172 : vector<32x128xf32>
    %174 = vector.broadcast %cst_105 : f32 to vector<32x128xf32>
    %175 = arith.subf %171, %174 : vector<32x128xf32>
    %176 = arith.cmpf one, %175, %175 : vector<32x128xf32>
    %177 = vector.broadcast %cst_105 : f32 to vector<32x128xf32>
    %178 = arith.addf %171, %177 : vector<32x128xf32>
    %179 = math.absf %175 : vector<32x128xf32>
    %cst_106 = arith.constant 0.000000e+00 : f32
    %180 = vector.broadcast %cst_106 : f32 to vector<32x128xf32>
    %181 = arith.subf %180, %179 : vector<32x128xf32>
    %182 = math.exp %181 : vector<32x128xf32>
    %183 = math.log1p %182 : vector<32x128xf32>
    %184 = arith.addf %173, %183 : vector<32x128xf32>
    %185 = arith.select %176, %178, %184 : vector<32x128xi1>, vector<32x128xf32>
    %186 = math.tanh %185 : vector<32x128xf32>
    %187 = arith.mulf %171, %186 : vector<32x128xf32>
    %c0_107 = arith.constant 0 : index
    %c0_108 = arith.constant 0 : index
    %188 = vector.load %arg11[%c0_107, %c0_108] : memref<64x128xf32, #tpu.memory_space<vmem>>, vector<64x128xf32>
    %cst_109 = arith.constant dense<0.000000e+00> : vector<32x128xf32>
    %189 = tpu.matmul %0, %188, %cst_109 {dimension_numbers = #tpu.dot_dimension_numbers<[1], [0], [0], [1], [0, 0, 1, 1], [], []>} : vector<32x64xf32>, vector<64x128xf32>, vector<32x128xf32> -> vector<32x128xf32>
    %190 = arith.addf %187, %189 : vector<32x128xf32>
    %c0_110 = arith.constant 0 : index
    %c0_111 = arith.constant 0 : index
    %191 = vector.load %arg12[%c0_110, %c0_111] : memref<1x128xf32, #tpu.memory_space<vmem>>, vector<1x128xf32>
    %192 = vector.broadcast %191 : vector<1x128xf32> to vector<32x128xf32>
    %193 = arith.addf %190, %192 : vector<32x128xf32>
    %c0_112 = arith.constant 0 : index
    %c0_113 = arith.constant 0 : index
    %194 = vector.load %arg17[%c0_112, %c0_113] : memref<32x128xf32, #tpu.memory_space<vmem>>, vector<32x128xf32>
    tpu.vector_store %arg17[%c0_112, %c0_113], %193 {strides = array<i32>} : memref<32x128xf32, #tpu.memory_space<vmem>>, vector<32x128xf32>,
    return
  }
  func.func @transform_0(%arg0: i32) -> (i32, i32) {
    %c0_i32 = arith.constant 0 : i32
    %c0_i32_0 = arith.constant 0 : i32
    return %arg0, %c0_i32 : i32, i32
  }
  func.func @transform_1(%arg0: i32) -> (i32, i32) {
    %c0_i32 = arith.constant 0 : i32
    %c0_i32_0 = arith.constant 0 : i32
    %c0_i32_1 = arith.constant 0 : i32
    return %c0_i32, %c0_i32_0 : i32, i32
  }
  func.func @transform_2(%arg0: i32) -> (i32, i32, i32) {
    %c0_i32 = arith.constant 0 : i32
    %c0_i32_0 = arith.constant 0 : i32
    %c0_i32_1 = arith.constant 0 : i32
    %c0_i32_2 = arith.constant 0 : i32
    return %c0_i32, %c0_i32_0, %c0_i32_1 : i32, i32, i32
  }
  func.func @transform_3(%arg0: i32) -> (i32, i32) {
    %c0_i32 = arith.constant 0 : i32
    %c0_i32_0 = arith.constant 0 : i32
    %c0_i32_1 = arith.constant 0 : i32
    return %c0_i32, %c0_i32_0 : i32, i32
  }
  func.func @transform_4(%arg0: i32) -> (i32, i32) {
    %c0_i32 = arith.constant 0 : i32
    %c0_i32_0 = arith.constant 0 : i32
    %c0_i32_1 = arith.constant 0 : i32
    return %c0_i32, %c0_i32_0 : i32, i32
  }
  func.func @transform_5(%arg0: i32) -> (i32, i32) {
    %c0_i32 = arith.constant 0 : i32
    %c0_i32_0 = arith.constant 0 : i32
    %c0_i32_1 = arith.constant 0 : i32
    return %c0_i32, %c0_i32_0 : i32, i32
  }
  func.func @transform_6(%arg0: i32) -> (i32, i32) {
    %c0_i32 = arith.constant 0 : i32
    %c0_i32_0 = arith.constant 0 : i32
    %c0_i32_1 = arith.constant 0 : i32
    return %c0_i32, %c0_i32_0 : i32, i32
  }
  func.func @transform_7(%arg0: i32) -> (i32, i32, i32) {
    %c0_i32 = arith.constant 0 : i32
    %c0_i32_0 = arith.constant 0 : i32
    %c0_i32_1 = arith.constant 0 : i32
    %c0_i32_2 = arith.constant 0 : i32
    return %c0_i32, %c0_i32_0, %c0_i32_1 : i32, i32, i32
  }
  func.func @transform_8(%arg0: i32) -> (i32, i32) {
    %c0_i32 = arith.constant 0 : i32
    %c0_i32_0 = arith.constant 0 : i32
    %c0_i32_1 = arith.constant 0 : i32
    return %c0_i32, %c0_i32_0 : i32, i32
  }
  func.func @transform_9(%arg0: i32) -> (i32, i32) {
    %c0_i32 = arith.constant 0 : i32
    %c0_i32_0 = arith.constant 0 : i32
    %c0_i32_1 = arith.constant 0 : i32
    return %c0_i32, %c0_i32_0 : i32, i32
  }
  func.func @transform_10(%arg0: i32) -> (i32, i32) {
    %c0_i32 = arith.constant 0 : i32
    %c0_i32_0 = arith.constant 0 : i32
    %c0_i32_1 = arith.constant 0 : i32
    return %c0_i32, %c0_i32_0 : i32, i32
  }
  func.func @transform_11(%arg0: i32) -> (i32, i32) {
    %c0_i32 = arith.constant 0 : i32
    %c0_i32_0 = arith.constant 0 : i32
    %c0_i32_1 = arith.constant 0 : i32
    return %c0_i32, %c0_i32_0 : i32, i32
  }
  func.func @transform_12(%arg0: i32) -> (i32, i32) {
    %c0_i32 = arith.constant 0 : i32
    %c0_i32_0 = arith.constant 0 : i32
    %c0_i32_1 = arith.constant 0 : i32
    return %c0_i32, %c0_i32_0 : i32, i32
  }
  func.func @transform_13(%arg0: i32) -> (i32, i32) {
    %c0_i32 = arith.constant 0 : i32
    %c0_i32_0 = arith.constant 0 : i32
    %c0_i32_1 = arith.constant 0 : i32
    return %c0_i32, %c0_i32_0 : i32, i32
  }
  func.func @transform_14(%arg0: i32) -> (i32, i32) {
    %c0_i32 = arith.constant 0 : i32
    %c0_i32_0 = arith.constant 0 : i32
    %c0_i32_1 = arith.constant 0 : i32
    return %c0_i32, %c0_i32_0 : i32, i32
  }
  func.func @transform_15(%arg0: i32) -> (i32, i32) {
    %c0_i32 = arith.constant 0 : i32
    %c0_i32_0 = arith.constant 0 : i32
    %c0_i32_1 = arith.constant 0 : i32
    return %c0_i32, %c0_i32_0 : i32, i32
  }
  func.func @transform_16(%arg0: i32) -> (i32, i32) {
    %c0_i32 = arith.constant 0 : i32
    %c0_i32_0 = arith.constant 0 : i32
    return %arg0, %c0_i32 : i32, i32
  }
}

</mosaic_0001>

<bundles_post_ra>
// kernel: tpu_custom_call.1
= control target key start
LH: loop header
LB: loop body
LE: loop exit
PB: predicated region body
PF: predicated region fallthrough
CT: control target
= control target key end

     0   :  { %s4556_s0 = inlined_call_operand.vmem [shape: f32[32,64], index: 0, kind: input, shape index: {}]   ;;  %s4557_s1 = inlined_call_operand.vmem [shape: f32[2,8], index: 1, kind: input, shape index: {}]   ;;  %s4558_s2 = inlined_call_operand.hbm [shape: f32[3,64,128], index: 2, kind: input, shape index: {}]   ;;  %s4559_s3 = inlined_call_operand.vmem [shape: f32[8,128], index: 3, kind: input, shape index: {}]   ;;  %s4560_s4 = inlined_call_operand.vmem [shape: f32[1,128], index: 4, kind: input, shape index: {}]   ;;  %s4561_s5 = inlined_call_operand.vmem [shape: f32[8,128], index: 5, kind: input, shape index: {}]   ;;  %s4562_s6 = inlined_call_operand.vmem [shape: f32[1,128], index: 6, kind: input, shape index: {}]   ;;  %s4563_s7 = inlined_call_operand.hbm [shape: f32[3,128,128], index: 7, kind: input, shape index: {}]   ;;  %s4564_s8 = inlined_call_operand.vmem [shape: f32[8,128], index: 8, kind: input, shape index: {}]   ;;  %s4565_s9 = inlined_call_operand.vmem [shape: f32[1,128], index: 9, kind: input, shape index: {}]   ;;  %s4566_s10 = inlined_call_operand.vmem [shape: f32[64,128], index: 10, kind: input, shape index: {}]   ;;  %s4567_s11 = inlined_call_operand.vmem [shape: f32[1,128], index: 11, kind: input, shape index: {}]   ;;  %s4568_s12 = inlined_call_operand.vmem [shape: f32[128,8], index: 12, kind: input, shape index: {}]   ;;  %s4569_s13 = inlined_call_operand.vmem [shape: f32[8,128], index: 13, kind: input, shape index: {}]   ;;  %s4570_s14 = inlined_call_operand.vmem [shape: f32[2,32], index: 14, kind: input, shape index: {}]   ;;  %s4571_s15 = inlined_call_operand.vmem [shape: f32[32,2], index: 15, kind: input, shape index: {}]   ;;  %s4572_s16 = inlined_call_operand.hbm [shape: f32[32,128], index: 16, kind: output, shape index: {}]  }
   0x1   :  { %4576 = sst [smem:[#allocation11_spill]] %s4556_s0 }
   0x2   :  { %21 = vsyncpa [#allocation3], 0 }
   0x3   :  { %22 = vsyncpa [#allocation6], 0 }
   0x4   :  { %23 = vsyncpa [#allocation4], 0  ;;  %s3795_s21 = smov [#allocation2]   ;;  %s3723_s25 = scalar_lea.hbm %s4558_s2, 3072 }
   0x5   :  { %s33_s22 = sshll.u32 %s3795_s21, 4  ;;  %p3724_p0 = scmp.ne.s32.totalorder %s4558_s2, %s3723_s25  ;;  %s34_s22 = int_to_ptr.vmem [resolvable:$true] %s33_s22 }
   0x6   :  { %p3727_p1 = scmp.lt.u32.totalorder %s3723_s25, %s4558_s2 }
   0x8   :  { %p3729_p2 = pnand %p3727_p1, %p3724_p0 }
   0xa   :  { %3732 = shalt.err (!%p3729_p2)
}
   0xb   :  { %s3733_s30 = scalar_lea.vmem %s34_s22, 3072  ;;  %p3738_p4 = scmp.lt.s32.totalorder %s34_s22, %s34_s22 }
   0xc   :  { %p3734_p3 = scmp.ne.s32.totalorder %s34_s22, %s3733_s30  ;;  %p3739_p5 = scmp.lt.s32.totalorder %s3733_s30, %s3733_s30 }
   0xe   :  { %p3740_p6 = por %p3739_p5, %p3738_p4 }
  0x10   :  { %p3741_p7 = pnand %p3740_p6, %p3734_p3 }
  0x12   :  { %3744 = shalt.err (!%p3741_p7)
}
  0x13   :  { %s3796_s0 = smov 128   ;;  %s3797_s17 = smov 8  }
  0x14   :  { %39 = dma.hbm_to_vmem [thread:$0]  %s4558_s2, 3072, %s34_s22, [#allocation3], %s3796_s0, %s3796_s0, %s3797_s17  }
  0x15   :  { %s3798_s20 = smov [#allocation5]   ;;  %s3745_s25 = scalar_lea.hbm %s4563_s7, 6144 }
  0x16   :  { %s53_s21 = sshll.u32 %s3798_s20, 4  ;;  %p3746_p8 = scmp.ne.s32.totalorder %s4563_s7, %s3745_s25  ;;  %s54_s21 = int_to_ptr.vmem [resolvable:$true] %s53_s21 }
  0x17   :  { %p3749_p9 = scmp.lt.u32.totalorder %s3745_s25, %s4563_s7 }
  0x19   :  { %p3751_p10 = pnand %p3749_p9, %p3746_p8 }
  0x1b   :  { %3754 = shalt.err (!%p3751_p10)
}
  0x1c   :  { %s3755_s30 = scalar_lea.vmem %s54_s21, 6144  ;;  %p3760_p12 = scmp.lt.s32.totalorder %s54_s21, %s54_s21 }
  0x1d   :  { %p3756_p11 = scmp.ne.s32.totalorder %s54_s21, %s3755_s30  ;;  %p3761_p13 = scmp.lt.s32.totalorder %s3755_s30, %s3755_s30 }
  0x1f   :  { %p3762_p0 = por %p3761_p13, %p3760_p12 }
  0x21   :  { %p3763_p1 = pnand %p3762_p0, %p3756_p11 }
  0x23   :  { %3766 = shalt.err (!%p3763_p1)
}
  0x24   :  { %59 = dma.hbm_to_vmem [thread:$0]  %s4563_s7, 6144, %s54_s21, [#allocation6], %s3796_s0, %s3796_s0, %s3797_s17  }
  0x25   :  { %3789 = dma.done.wait [#allocation3], 3072  }
  0x26   :  { %3790 = vsyncadd [#allocation3], 4294964224 }
  0x27   :  { %3791 = dma.done.wait [#allocation6], 6144  }
  0x28   :  { %3792 = vsyncadd [#allocation6], 4294961152  ;;  %v103_v0 = vlaneseq  ;;  %v182_v2 = vld [vmem:[#allocation2] sm:$0xff]  ;;  %v183_v3 = vld [vmem:[#allocation2 + $0x8] sm:$0xff]  ;;  %s4577_s7 = sld [smem:[#allocation11_spill]]  ;;  %vm190_vm2 = vcmask 523264  }
  0x29   :  { %v184_v4 = vld [vmem:[#allocation2 + $0x10] sm:$0xff]  ;;  %v3357_v6 = vpack.c.bf16 %v183_v3, %v182_v2  ;;  %v185_v7 = vld [vmem:[#allocation2 + $0x18] sm:$0xff]  ;;  %v186_v9 = vld [vmem:[#allocation2 + $0x20] sm:$0xff]  ;;  %vm3800_vm7 = vmmov 0   ;;  %vm513_vm8 = vcmask 261120   ;;  %vm658_vm9 = vcmask 64512  }
  0x2a   :  { %v3918_v1 = vshrl.u32 %v103_v0, 7  ;;  %v3361_v8 = vpack.c.bf16 %v185_v7, %v184_v4  ;;  %v187_v10 = vld [vmem:[#allocation2 + $0x28] sm:$0xff]  ;;  %v188_v17 = vld [vmem:[#allocation2 + $0x30] sm:$0xff]  ;;  %v189_v18 = vld [vmem:[#allocation2 + $0x38] sm:$0xff]  ;;  %vm4575_vm10 = vcmask 15360   ;;  %vm4574_vm11 = vcmask 1041408  }
  0x2b   :  { %3358 = vmatprep.subr.bf16.mxu0 %v3357_v6  ;;  %v3365_v16 = vpack.c.bf16 %v187_v10, %v186_v9  ;;  %v3369_v23 = vpack.c.bf16 %v189_v18, %v188_v17  ;;  %v157_v25 = vld [vmem:[#allocation2 + $0x40] sm:$0xff]  ;;  %v158_v26 = vld [vmem:[#allocation2 + $0x48] sm:$0xff]  ;;  %v159_v31 = vld [vmem:[#allocation2 + $0x50] sm:$0xff]  ;;  %v3799_v10 = vmov 0.0|0.0   ;;  %s3802_s2 = smov [#allocation7]  }
  0x2c   :  { %v112_v5 = vand.u32 15, %v3918_v1  ;;  %vm173_vm0 = vcmp.lt.s32.totalorder %v3918_v1, 1  ;;  %3360 = vmatpush3.bf16.msra.mxu0 %v3357_v6  ;;  %v106_v20 = vadd.s32 16, %v3918_v1  ;;  %v3373_v30 = vpack.c.bf16 %v158_v26, %v157_v25  ;;  %v160_v32 = vld [vmem:[#allocation2 + $0x58] sm:$0xff]  ;;  %v161_v38 = vld [vmem:[#allocation2 + $0x60] sm:$0xff]  ;;  %v162_v39 = vld [vmem:[#allocation2 + $0x68] sm:$0xff]  ;;  %3405 = vmatprep.subr.bf16.mxu1 %v3799_v10 }
  0x2d   :  { %3362 = vmatprep.subr.bf16.mxu0 %v3361_v8  ;;  %v3377_v36 = vpack.c.bf16 %v160_v32, %v159_v31  ;;  %v3381_v41 = vpack.c.bf16 %v162_v39, %v161_v38  ;;  %v163_v42 = vld [vmem:[#allocation2 + $0x70] sm:$0xff]  ;;  %v164_v43 = vld [vmem:[#allocation2 + $0x78] sm:$0xff]  ;;  %v403_v45 = vld [vmem:[#allocation2 + $0x80] sm:$0xff]  ;;  %vm393_vm4 = vcmp.lt.s32.totalorder %v3918_v1, 7  ;;  %v105_v57 = vadd.s32 8, %v3918_v1  ;;  %s2600_s22 = sshll.u32 %s3802_s2, 4  ;;  %s2601_s22 = int_to_ptr.vmem [resolvable:$true] %s2600_s22 }
  0x2e   :  { %v3924_v11 = vld [vmem:[%s4577_s7] sm:$0xff]  ;;  %v3929_v12 = vld [vmem:[%s4577_s7 + $0x18] sm:$0xff]  ;;  %vm3933_vm1 = vcmp.eq.s32.totalorder %v112_v5, 0  ;;  %v3946_v22 = vld [vmem:[%s4577_s7 + $0x10] sm:$0xff]  ;;  %v126_v27 = vand.u32 15, %v106_v20  ;;  %v3385_v44 = vpack.c.bf16 %v164_v43, %v163_v42  ;;  %v107_v63 = vadd.s32 24, %v3918_v1  ;;  %p3772_p3 = scmp.lt.s32.totalorder %s2601_s22, %s2601_s22 }
  0x2f   :  { %v169_v13 = vrot.slane %v3924_v11, 7  ;;  %v172_v15 = vrot.slane %v3929_v12, 7  ;;  %v3952_v24 = vld [vmem:[%s4577_s7 + $0x8] sm:$0xff]  ;;  %v171_v28 = vrot.slane %v3946_v22, 7  ;;  %v405_v48 = vld [vmem:[#allocation2 + $0x90] sm:$0xff]  ;;  %v406_v49 = vld [vmem:[#allocation2 + $0x98] sm:$0xff] }
  0x30   :  { %3364 = vmatpush3.bf16.msra.mxu0 %v3361_v8  ;;  %v170_v29 = vrot.slane %v3952_v24, 7  ;;  %vm3956_vm3 = vcmp.eq.s32.totalorder %v126_v27, 0  ;;  %v404_v46 = vld [vmem:[#allocation2 + $0x88] sm:$0xff]  ;;  %v3393_v50 = vpack.c.bf16 %v406_v49, %v405_v48  ;;  %v389_v51 = vrot.slane %v3924_v11, 1  ;;  %v407_v53 = vld [vmem:[#allocation2 + $0xa0] sm:$0xff]  ;;  %v409_v58 = vld [vmem:[#allocation2 + $0xb0] sm:$0xff] }
  0x31   :  { %v177_v19 = vsel %vm173_vm0, %v172_v15, %v169_v13  ;;  %3366 = vmatprep.subr.bf16.mxu0 %v3365_v16  ;;  %v174_v40 = vsel %vm173_vm0, %v171_v28, %v172_v15  ;;  %v3389_v47 = vpack.c.bf16 %v404_v46, %v403_v45  ;;  %v390_v52 = vrot.slane %v3952_v24, 1  ;;  %v408_v54 = vld [vmem:[#allocation2 + $0xa8] sm:$0xff]  ;;  %v410_v59 = vld [vmem:[#allocation2 + $0xb8] sm:$0xff]  ;;  %v86_v18 = vld [vmem:[%s4568_s12] sm:$0xff] }
  0x32   :  { %v178_v21 = vsel %vm3933_vm1, 0.0, %v177_v19  ;;  %v175_v34 = vsel %vm173_vm0, %v170_v29, %v171_v28  ;;  %v176_v35 = vsel %vm173_vm0, %v169_v13, %v170_v29  ;;  %v3397_v55 = vpack.c.bf16 %v408_v54, %v407_v53  ;;  %v87_v19 = vld [vmem:[%s4568_s12 + $0x8] sm:$0xff]  ;;  %v90_v26 = vld [vmem:[%s4568_s12 + $0x20] sm:$0xff]  ;;  %v92_v29 = vld [vmem:[%s4568_s12 + $0x30] sm:$0xff] }
  0x33   :  { %2922 = vmatprep.mubr.msk.f32.mxu0 %vm190_vm2, %v178_v21  ;;  %v180_v37 = vsel %vm3956_vm3, 0.0, %v175_v34  ;;  %v396_v56 = vsel %vm393_vm4, %v389_v51, %v390_v52  ;;  %v3401_v60 = vpack.c.bf16 %v410_v59, %v409_v58  ;;  %v119_v61 = vand.u32 15, %v105_v57  ;;  %v4038_v21 = vld [vmem:[%s4570_s14] sm:$0x3]  ;;  %v91_v27 = vld [vmem:[%s4568_s12 + $0x28] sm:$0xff]  ;;  %v100_v42 = vld [vmem:[%s4568_s12 + $0x70] sm:$0xff] }
  0x34   :  { %3368 = vmatpush3.bf16.msra.mxu0 %v3365_v16  ;;  %v391_v62 = vrot.slane %v3946_v22, 1  ;;  %v392_v3 = vrot.slane %v3929_v12, 1  ;;  %v133_v4 = vand.u32 15, %v107_v63  ;;  %v4064_v28 = vpack.c.bf16 %v91_v27, %v90_v26  ;;  %v94_v32 = vld [vmem:[%s4568_s12 + $0x40] sm:$0xff]  ;;  %v95_v34 = vld [vmem:[%s4568_s12 + $0x48] sm:$0xff]  ;;  %v101_v43 = vld [vmem:[%s4568_s12 + $0x78] sm:$0xff] }
  0x35   :  { %3370 = vmatprep.subr.bf16.mxu0 %v3369_v23  ;;  %vm3988_vm5 = vcmp.eq.s32.totalorder %v119_v61, 15  ;;  %v98_v39 = vld [vmem:[%s4568_s12 + $0x60] sm:$0xff]  ;;  %v4138_v53 = vld [vmem:[%s4571_s15 + $0x8] sm:$0xff] }
  0x36   :  { %v395_v2 = vsel %vm393_vm4, %v390_v52, %v391_v62  ;;  %v394_v6 = vsel %vm393_vm4, %v391_v62, %v392_v3  ;;  %vm3999_vm6 = vcmp.eq.s32.totalorder %v133_v4, 15  ;;  %v397_v8 = vsel %vm393_vm4, %v392_v3, %v389_v51  ;;  %v4131_v51 = vld [vmem:[%s4571_s15] sm:$0xff] }
  0x37   :  { %v399_v5 = vsel %vm3988_vm5, 0.0, %v395_v2  ;;  %v401_v9 = vsel %vm3999_vm6, 0.0, %v397_v8 }
  0x38   :  { %3372 = vmatpush3.bf16.msra.mxu0 %v3369_v23  ;;  %v88_v23 = vld [vmem:[%s4568_s12 + $0x10] sm:$0xff] }
  0x39   :  { %3374 = vmatprep.subr.bf16.mxu0 %v3373_v30 }
  0x3b   :  { %2923 = vmatmul.mubr.msk.f32.vlgmr.msra.gmra.mrb[0].mxu0 %vm190_vm2, %v176_v35  ;;  %v4084_v35 = vpack.c.bf16 %v95_v34, %v94_v32 }
  0x3c   :  { %3376 = vmatpush3.bf16.msra.mxu0 %v3373_v30  ;;  %2925 = vmatprep.mubr.msk.f32.mxu0 %vm190_vm2, %v180_v37  ;;  %v93_v30 = vld [vmem:[%s4568_s12 + $0x38] sm:$0xff] }
  0x3d   :  { %3378 = vmatprep.subr.bf16.mxu0 %v3377_v36  ;;  %v4074_v31 = vpack.c.bf16 %v93_v30, %v92_v29  ;;  %v97_v37 = vld [vmem:[%s4568_s12 + $0x58] sm:$0xff] }
  0x3f   :  { %2926 = vmatmul.mubr.msk.f32.gmra.mrb[2].mxu0 %vm190_vm2, %v174_v40  ;;  %v99_v40 = vld [vmem:[%s4568_s12 + $0x68] sm:$0xff] }
  0x40   :  { %3380 = vmatpush3.bf16.msra.mxu0 %v3377_v36  ;;  %2944 = vmatprep.mubr.msk.f32.mxu0 %vm190_vm2, %v3924_v11  ;;  %v3801_v11 = vmov 0.0   ;;  %v96_v36 = vld [vmem:[%s4568_s12 + $0x50] sm:$0xff] }
  0x41   :  { %3382 = vmatprep.subr.bf16.mxu0 %v3381_v41  ;;  %2980 = vmatprep.mubr.msk.f32.mxu1 %vm3800_vm7, %v3801_v11  ;;  %v4094_v38 = vpack.c.bf16 %v97_v37, %v96_v36 }
  0x44   :  { %3384 = vmatpush3.bf16.msra.mxu0 %v3381_v41  ;;  %v4104_v41 = vpack.c.bf16 %v99_v40, %v98_v39 }
  0x45   :  { %3386 = vmatprep.subr.bf16.mxu0 %v3385_v44 }
  0x48   :  { %3388 = vmatpush3.bf16.msra.mxu0 %v3385_v44  ;;  %v4114_v44 = vpack.c.bf16 %v101_v43, %v100_v42 }
  0x49   :  { %3390 = vmatprep.subr.bf16.mxu0 %v3389_v47 }
  0x4b   :  { %2945 = vmatmul.mubr.msk.f32.vlgmr.msra.gmra.mrb[0].mxu0 %vm190_vm2, %v3952_v24  ;;  %v89_v24 = vld [vmem:[%s4568_s12 + $0x18] sm:$0xff] }
  0x4c   :  { %3392 = vmatpush3.bf16.msra.mxu0 %v3389_v47  ;;  %2947 = vmatprep.mubr.msk.f32.mxu0 %vm190_vm2, %v3946_v22  ;;  %v4040_v22 = vpack.c.bf16 %v87_v19, %v86_v18  ;;  %v4052_v25 = vpack.c.bf16 %v89_v24, %v88_v23  ;;  %v4124_v47 = vld [vmem:[%s4569_s13] sm:$0xff] }
  0x4d   :  { %3394 = vmatprep.subr.bf16.mxu0 %v3393_v50 }
  0x4f   :  { %2948 = vmatmul.mubr.msk.f32.gmra.mrb[2].mxu0 %vm190_vm2, %v3929_v12 }
  0x50   :  { %3396 = vmatpush3.bf16.msra.mxu0 %v3393_v50  ;;  %2966 = vmatprep.mubr.msk.f32.mxu0 %vm190_vm2, %v396_v56  ;;  %v4155_v56 = vld [vmem:[%s4571_s15 + $0x18] sm:$0xff] }
  0x51   :  { %3398 = vmatprep.subr.bf16.mxu0 %v3397_v55 }
  0x54   :  { %3400 = vmatpush3.bf16.msra.mxu0 %v3397_v55  ;;  %v4144_v55 = vld [vmem:[%s4571_s15 + $0x10] sm:$0xff] }
  0x55   :  { %3402 = vmatprep.subr.bf16.mxu0 %v3401_v60 }
  0x58   :  { %3404 = vmatpush3.bf16.msra.mxu0 %v3401_v60 }
  0x59   :  { %3435 = vmatprep.subr.bf16.mxu0 %v3799_v10 }
  0x5b   :  { %2967 = vmatmul.mubr.msk.f32.vlgmr.msra.gmra.mrb[0].mxu0 %vm190_vm2, %v399_v5 }
  0x5c   :  { %2969 = vmatprep.mubr.msk.f32.mxu0 %vm190_vm2, %v394_v6 }
  0x5f   :  { %2970 = vmatmul.mubr.msk.f32.gmra.mrb[2].mxu0 %vm190_vm2, %v401_v9 }
  0x60   :  { %3039 = vmatprep.mubr.msk.f32.mxu0 %vm3800_vm7, %v3801_v11 }
 0x12e   :  { %v4016_v12 = vpop.f32.mrb[0].mxu0 }
 0x12f   :  { %v4018_v13 = vpop.f32.mrb[1].mxu0 }
 0x130   :  { %v3406_v15 = vpack.c.bf16 %v4016_v12, %v4018_v13 }
 0x132   :  { %v4022_v16 = vpop.f32.mrb[2].mxu0  ;;  %3407 = vmatpush3.bf16.msra.mxu1 %v3406_v15  ;;  %v989_v15 = vld [vmem:[%s4559_s3] sm:$0xff] }
 0x133   :  { %v4024_v17 = vpop.f32.mrb[3].mxu0  ;;  %3408 = vmatprep.subr.bf16.mxu1 %v3799_v10 }
 0x134   :  { %v3409_v20 = vpack.c.bf16 %v4022_v16, %v4024_v17 }
 0x136   :  { %3410 = vmatpush3.bf16.msra.mxu1 %v3409_v20 }
 0x137   :  { %3411 = vmatprep.subr.bf16.mxu1 %v3799_v10 }
 0x139   :  { %2981 = vmatmul.mubr.msk.f32.vlgmr.msra.gmra.mrb[0].mxu1 %vm513_vm8, %v4038_v21 }
 0x13a   :  { %3413 = vmatpush3.bf16.msra.mxu1 %v4040_v22  ;;  %3015 = vmatprep.mubr.msk.f32.mxu1 %vm3800_vm7, %v3801_v11 }
 0x13b   :  { %3414 = vmatprep.subr.bf16.mxu1 %v3799_v10 }
 0x13e   :  { %3416 = vmatpush3.bf16.msra.mxu1 %v4052_v25 }
 0x13f   :  { %3417 = vmatprep.subr.bf16.mxu1 %v3799_v10 }
 0x142   :  { %3419 = vmatpush3.bf16.msra.mxu1 %v4064_v28 }
 0x143   :  { %3420 = vmatprep.subr.bf16.mxu1 %v3799_v10 }
 0x146   :  { %3422 = vmatpush3.bf16.msra.mxu1 %v4074_v31 }
 0x147   :  { %3423 = vmatprep.subr.bf16.mxu1 %v3799_v10 }
 0x14a   :  { %3425 = vmatpush3.bf16.msra.mxu1 %v4084_v35 }
 0x14b   :  { %3426 = vmatprep.subr.bf16.mxu1 %v3799_v10 }
 0x14e   :  { %3428 = vmatpush3.bf16.msra.mxu1 %v4094_v38 }
 0x14f   :  { %3429 = vmatprep.subr.bf16.mxu1 %v3799_v10 }
 0x152   :  { %3431 = vmatpush3.bf16.msra.mxu1 %v4104_v41 }
 0x153   :  { %3432 = vmatprep.subr.bf16.mxu1 %v3799_v10 }
 0x156   :  { %3434 = vmatpush3.bf16.msra.mxu1 %v4114_v44 }
 0x157   :  { %3018 = vmatprep.subr.mxu1 %v3801_v11 }
 0x20c   :  { %v583_v45 = vpop.f32.mrb[0].mxu1 }
 0x20d   :  { %v2982_v46 = vpop.f32.mrb[1].mxu1  ;;  %3016 = vmatmul.mubr.f32.vlgmr.msra.gmra.mrb[2].mxu1 %v583_v45 }
 0x20e   :  { %3020 = vmatprep.mubr.msk.f32.mxu1 %vm3800_vm7, %v3801_v11  ;;  %3019 = vmatpush3.msra.mxu1 %v4124_v47 }
 0x2e0   :  { %v653_v48 = vpop.f32.mrb[2].mxu1 }
 0x2e1   :  { %v657_v49 = vmul.f32 0.00390625, %v653_v48  ;;  %v3017_v50 = vpop.f32.mrb[3].mxu1  ;;  %v1267_v48 = vld [vmem:[%s4561_s5] sm:$0xff] }
 0x2e3   :  { %3021 = vmatmul.mubr.msk.f32.vlgmr.msra.gmra.mrb[4].mxu1 %vm658_vm9, %v657_v49 }
 0x2e4   :  { %3025 = vmatprep.mubr.msk.f32.mxu1 %vm4575_vm10, %v4131_v51 }
 0x3b6   :  { %v728_v52 = vpop.f32.mrb[4].mxu1 }
 0x3b7   :  { %v3022_v54 = vpop.f32.mrb[5].mxu1  ;;  %3023 = vmatprep.subr.msk.mxu1 %vm4574_vm11, %v728_v52 }
 0x3b8   :  { %3024 = vmatpush3.msk.msra.mxu1 %vm4574_vm11, %v728_v52 }
 0x3b9   :  { %3026 = vmatmul.mubr.msk.f32.vlgmr.msra.gmra.mrb[6].mxu1 %vm4575_vm10, %v4138_v53  ;;  %3441 = vmatprep.subr.bf16.mxu1 %v3799_v10 }
 0x3ba   :  { %3028 = vmatprep.mubr.msk.f32.mxu1 %vm4575_vm10, %v4144_v55  ;;  %3443 = vmatpush3.bf16.msra.mxu1 %v4040_v22 }
 0x3bb   :  { %3444 = vmatprep.subr.bf16.mxu1 %v3799_v10 }
 0x3bd   :  { %3029 = vmatmul.mubr.msk.f32.gmra.mrb[8].mxu1 %vm4575_vm10, %v4155_v56 }
 0x3be   :  { %3446 = vmatpush3.bf16.msra.mxu1 %v4052_v25  ;;  %3074 = vmatprep.mubr.msk.f32.mxu1 %vm3800_vm7, %v3801_v11 }
 0x3bf   :  { %3447 = vmatprep.subr.bf16.mxu1 %v3799_v10 }
 0x3c2   :  { %3449 = vmatpush3.bf16.msra.mxu1 %v4064_v28 }
 0x3c3   :  { %3450 = vmatprep.subr.bf16.mxu1 %v3799_v10 }
 0x3c6   :  { %3452 = vmatpush3.bf16.msra.mxu1 %v4074_v31 }
 0x3c7   :  { %3453 = vmatprep.subr.bf16.mxu1 %v3799_v10 }
 0x3ca   :  { %3455 = vmatpush3.bf16.msra.mxu1 %v4084_v35 }
 0x3cb   :  { %3456 = vmatprep.subr.bf16.mxu1 %v3799_v10 }
 0x3ce   :  { %3458 = vmatpush3.bf16.msra.mxu1 %v4094_v38 }
 0x3cf   :  { %3459 = vmatprep.subr.bf16.mxu1 %v3799_v10 }
 0x3d2   :  { %3461 = vmatpush3.bf16.msra.mxu1 %v4104_v41 }
 0x3d3   :  { %3462 = vmatprep.subr.bf16.mxu1 %v3799_v10 }
 0x3d6   :  { %3464 = vmatpush3.bf16.msra.mxu1 %v4114_v44 }
 0x48c   :  { %v3027_v57 = vpop.f32.mrb[6].mxu1 }
 0x48d   :  { %v4177_v58 = vsub.f32 %v4016_v12, %v3027_v57  ;;  %v819_v59 = vpop.f32.mrb[7].mxu1  ;;  %v2640_v57 = vld [vmem:[%s4562_s6] ss:$0 sm:$0xff] }
 0x48e   :  { %v4180_v60 = vsub.f32 %v4018_v13, %v819_v59 }
 0x48f   :  { %v843_v61 = vmul.f32 %v4177_v58, %v4177_v58 }
 0x490   :  { %v842_v62 = vmul.f32 %v4180_v60, %v4180_v60  ;;  %v3030_v63 = vpop.f32.mrb[8].mxu1 }
 0x491   :  { %v4187_v2 = vsub.f32 %v4022_v16, %v3030_v63  ;;  %v829_v3 = vpop.f32.mrb[9].mxu1  ;;  %v1246_v16 = vld [vmem:[%s4557_s1] sm:$0x3] }
 0x492   :  { %v3436_v4 = vpack.c.bf16 %v843_v61, %v842_v62  ;;  %v4190_v5 = vsub.f32 %v4024_v17, %v829_v3  ;;  %v1250_v17 = vand.u32 2147483647, %v1246_v16  ;;  %v1247_v34 = vmax.f32 %v1246_v16, 0.0  ;;  %v1469_v63 = vld [vmem:[#allocation5] sm:$0xff]  ;;  %v1470_v3 = vld [vmem:[#allocation5 + $0x8] sm:$0xff] }
 0x493   :  { %v845_v6 = vmul.f32 %v4187_v2, %v4187_v2  ;;  %vm1248_vm13 = vcmp.ne.f32.partialorder %v1246_v16, %v1246_v16 }
 0x494   :  { %v844_v8 = vmul.f32 %v4190_v5, %v4190_v5  ;;  %3437 = vmatpush3.bf16.msra.mxu0 %v3436_v4  ;;  %v1251_v18 = vsub.f32 0.0, %v1250_v17  ;;  %v3465_v4 = vpack.c.bf16 %v1470_v3, %v1469_v63  ;;  %v1476_v17 = vld [vmem:[#allocation5 + $0x38] sm:$0xff] }
 0x495   :  { %3438 = vmatprep.subr.bf16.mxu0 %v3799_v10 }
 0x496   :  { %v3439_v9 = vpack.c.bf16 %v845_v6, %v844_v8  ;;  %v1252_v19 = vmul.f32 1.442695, %v1251_v18  ;;  %v1471_v6 = vld [vmem:[#allocation5 + $0x10] sm:$0xff]  ;;  %v1472_v8 = vld [vmem:[#allocation5 + $0x18] sm:$0xff] }
 0x498   :  { %3440 = vmatpush3.bf16.msra.mxu0 %v3439_v9  ;;  %3661 = vpow2.f32 %v1252_v19  ;;  %v3469_v9 = vpack.c.bf16 %v1472_v8, %v1471_v6  ;;  %v1477_v19 = vld [vmem:[#allocation5 + $0x40] sm:$0xff] }
 0x499   :  { %3077 = vmatprep.subr.mxu0 %v3801_v11 }
 0x49b   :  { %3040 = vmatmul.mubr.msk.f32.vlgmr.msra.gmra.mrb[4].mxu0 %vm513_vm8, %v4038_v21 }
 0x49c   :  { %3079 = vmatprep.mubr.msk.f32.mxu0 %vm3800_vm7, %v3801_v11  ;;  %3078 = vmatpush3.msra.mxu0 %v989_v15 }
 0x49d   :  { %3090 = vmatprep.subr.mxu0 %v3801_v11 }
 0x4a2   :  { %v3662_v20 = vpop.eup %3661 }
 0x4a3   :  { %v1254_v23 = vadd.f32 1.0, %v3662_v20  ;;  %v1257_v24 = vmul.f32 -0.5, %v3662_v20  ;;  %v1260_v29 = vand.u32 2147483647, %v3662_v20 }
 0x4a5   :  { %3663 = vlog2.f32 %v1254_v23  ;;  %v1258_v26 = vadd.f32 1.0, %v1257_v24  ;;  %vm1261_vm12 = vcmp.lt.f32.partialorder %v1260_v29, 0.0004427343  ;;  %v1479_v23 = vld [vmem:[#allocation5 + $0x50] sm:$0xff]  ;;  %v1481_v29 = vld [vmem:[#allocation5 + $0x60] sm:$0xff] }
 0x4a7   :  { %v1259_v32 = vmul.f32 %v3662_v20, %v1258_v26  ;;  %v1478_v20 = vld [vmem:[#allocation5 + $0x48] sm:$0xff]  ;;  %v1480_v26 = vld [vmem:[#allocation5 + $0x58] sm:$0xff] }
 0x4a8   :  { %v3481_v24 = vpack.c.bf16 %v1478_v20, %v1477_v19 }
 0x4af   :  { %v3664_v27 = vpop.eup %3663 }
 0x4b0   :  { %v1256_v30 = vmul.f32 0.6931472, %v3664_v27  ;;  %v3485_v27 = vpack.c.bf16 %v1480_v26, %v1479_v23 }
 0x4b2   :  { %v1262_v36 = vsel %vm1261_vm12, %v1259_v32, %v1256_v30  ;;  %v1482_v30 = vld [vmem:[#allocation5 + $0x68] sm:$0xff] }
 0x4b3   :  { %v1263_v37 = vadd.f32 %v1262_v36, %v1247_v34  ;;  %v3489_v32 = vpack.c.bf16 %v1482_v30, %v1481_v29  ;;  %v1483_v34 = vld [vmem:[#allocation5 + $0x70] sm:$0xff]  ;;  %v1484_v36 = vld [vmem:[#allocation5 + $0x78] sm:$0xff] }
 0x4b5   :  { %v1264_v40 = vsel %vm1248_vm13, %v1246_v16, %v1263_v37  ;;  %v3493_v37 = vpack.c.bf16 %v1484_v36, %v1483_v34 }
 0x4b6   :  { %3665 = vtanh.f32 %v1264_v40  ;;  %v1442_v40 = vld [vmem:[#allocation5 + $0x88] sm:$0xff] }
 0x4c0   :  { %v3666_v46 = vpop.eup %3665 }
 0x4c1   :  { %v1266_v50 = vmul.f32 %v3666_v46, %v1246_v16  ;;  %v1475_v16 = vld [vmem:[#allocation5 + $0x30] sm:$0xff] }
 0x4c2   :  { %v3477_v18 = vpack.c.bf16 %v1476_v17, %v1475_v16 }
 0x56e   :  { %v912_v12 = vpop.f32.mrb[4].mxu0 }
 0x56f   :  { %v3041_v13 = vpop.f32.mrb[5].mxu0  ;;  %3075 = vmatmul.mubr.f32.vlgmr.msra.gmra.mrb[10].mxu1 %v912_v12  ;;  %v1473_v12 = vld [vmem:[#allocation5 + $0x20] sm:$0xff] }
 0x570   :  { %3084 = vmatprep.mubr.msk.f32.mxu1 %vm4575_vm10, %v4131_v51  ;;  %v1474_v13 = vld [vmem:[#allocation5 + $0x28] sm:$0xff] }
 0x571   :  { %v3473_v15 = vpack.c.bf16 %v1474_v13, %v1473_v12 }
 0x642   :  { %v982_v39 = vpop.f32.mrb[10].mxu1 }
 0x643   :  { %v986_v42 = vmul.f32 0.00390625, %v982_v39  ;;  %v3076_v43 = vpop.f32.mrb[11].mxu1  ;;  %v1441_v39 = vld [vmem:[#allocation5 + $0x80] sm:$0xff] }
 0x645   :  { %v987_v45 = vadd.f32 1e-05, %v986_v42  ;;  %v4242_v42 = vpack.c.bf16 %v1442_v40, %v1441_v39 }
 0x647   :  { %3667 = vrsqrt.f32 %v987_v45  ;;  %v2639_v45 = vld [vmem:[%s4560_s4] ss:$0 sm:$0xff] }
 0x651   :  { %v3668_v49 = vpop.eup %3667 }
 0x652   :  { %3080 = vmatmul.mubr.msk.f32.vlgmr.msra.gmra.mrb[6].mxu0 %vm658_vm9, %v3668_v49 }
 0x653   :  { %3091 = vmatpush3.msra.mxu0 %v1267_v48  ;;  %3092 = vmatprep.mubr.msk.f32.mxu0 %vm3800_vm7, %v3801_v11 }
 0x656   :  { %3093 = vmatmul.mubr.msk.f32.vlgmr.msra.gmra.mrb[8].mxu0 %vm658_vm9, %v1266_v50 }
 0x657   :  { %3097 = vmatprep.mubr.msk.f32.mxu0 %vm4575_vm10, %v4131_v51 }
 0x725   :  { %v1059_v52 = vpop.f32.mrb[6].mxu0 }
 0x726   :  { %v3081_v54 = vpop.f32.mrb[7].mxu0  ;;  %3082 = vmatprep.subr.msk.mxu1 %vm4574_vm11, %v1059_v52 }
 0x727   :  { %3083 = vmatpush3.msk.msra.mxu1 %vm4574_vm11, %v1059_v52 }
 0x728   :  { %3085 = vmatmul.mubr.msk.f32.vlgmr.msra.gmra.mrb[12].mxu1 %vm4575_vm10, %v4138_v53  ;;  %3561 = vmatprep.subr.bf16.mxu1 %v3799_v10 }
 0x729   :  { %3087 = vmatprep.mubr.msk.f32.mxu1 %vm4575_vm10, %v4144_v55  ;;  %v1344_v59 = vpop.f32.mrb[8].mxu0 }
 0x72a   :  { %v1345_v61 = vadd.f32 %v2640_v57, %v1344_v59  ;;  %v3094_v62 = vpop.f32.mrb[9].mxu0 }
 0x72c   :  { %3088 = vmatmul.mubr.msk.f32.gmra.mrb[14].mxu1 %vm4575_vm10, %v4155_v56  ;;  %3095 = vmatprep.subr.msk.mxu0 %vm4574_vm11, %v1345_v61 }
 0x72d   :  { %3096 = vmatpush3.msk.msra.mxu0 %vm4574_vm11, %v1345_v61  ;;  %3225 = vmatprep.mubr.msk.f32.mxu1 %vm3800_vm7, %v3801_v11 }
 0x72e   :  { %3098 = vmatmul.mubr.msk.f32.vlgmr.msra.gmra.mrb[10].mxu0 %vm4575_vm10, %v4138_v53  ;;  %3466 = vmatprep.subr.bf16.mxu0 %v3465_v4 }
 0x72f   :  { %3100 = vmatprep.mubr.msk.f32.mxu0 %vm4575_vm10, %v4144_v55  ;;  %3468 = vmatpush3.bf16.msra.mxu0 %v3465_v4 }
 0x730   :  { %3470 = vmatprep.subr.bf16.mxu0 %v3469_v9 }
 0x732   :  { %3101 = vmatmul.mubr.msk.f32.gmra.mrb[12].mxu0 %vm4575_vm10, %v4155_v56 }
 0x733   :  { %3472 = vmatpush3.bf16.msra.mxu0 %v3469_v9 }
 0x734   :  { %3474 = vmatprep.subr.bf16.mxu0 %v3473_v15 }
 0x737   :  { %3476 = vmatpush3.bf16.msra.mxu0 %v3473_v15 }
 0x738   :  { %3478 = vmatprep.subr.bf16.mxu0 %v3477_v18 }
 0x73b   :  { %3480 = vmatpush3.bf16.msra.mxu0 %v3477_v18 }
 0x73c   :  { %3482 = vmatprep.subr.bf16.mxu0 %v3481_v24 }
 0x73f   :  { %3484 = vmatpush3.bf16.msra.mxu0 %v3481_v24 }
 0x740   :  { %3486 = vmatprep.subr.bf16.mxu0 %v3485_v27 }
 0x743   :  { %3488 = vmatpush3.bf16.msra.mxu0 %v3485_v27 }
 0x744   :  { %3490 = vmatprep.subr.bf16.mxu0 %v3489_v32 }
 0x747   :  { %3492 = vmatpush3.bf16.msra.mxu0 %v3489_v32 }
 0x748   :  { %3494 = vmatprep.subr.bf16.mxu0 %v3493_v37 }
 0x74b   :  { %3496 = vmatpush3.bf16.msra.mxu0 %v3493_v37 }
 0x74c   :  { %3498 = vmatprep.subr.bf16.mxu0 %v4242_v42 }
 0x7fb   :  { %v3086_v43 = vpop.f32.mrb[12].mxu1 }
 0x7fc   :  { %v1152_v46 = vmul.f32 %v3086_v43, %v4177_v58  ;;  %v1132_v48 = vpop.f32.mrb[13].mxu1 }
 0x7fd   :  { %v1151_v49 = vmul.f32 %v1132_v48, %v4180_v60 }
 0x7fe   :  { %v4250_v50 = vadd.f32 %v2639_v45, %v1152_v46 }
 0x7ff   :  { %v4252_v52 = vadd.f32 %v2639_v45, %v1151_v49  ;;  %v3089_v54 = vpop.f32.mrb[14].mxu1 }
 0x800   :  { %v1179_v57 = vand.u32 2147483647, %v4250_v50  ;;  %v1154_v59 = vmul.f32 %v3089_v54, %v4187_v2  ;;  %v1142_v61 = vpop.f32.mrb[15].mxu1  ;;  %v1167_v49 = vmax.f32 %v4250_v50, 0.0  ;;  %vm1171_vm14 = vcmp.ne.f32.partialorder %v4250_v50, %v4250_v50 }
 0x801   :  { %v1178_v62 = vand.u32 2147483647, %v4252_v52  ;;  %v1153_v63 = vmul.f32 %v1142_v61, %v4190_v5  ;;  %v4258_v3 = vpop.f32.mrb[10].mxu0  ;;  %vm1170_vm13 = vcmp.ne.f32.partialorder %v4252_v52, %v4252_v52 }
 0x802   :  { %v1183_v58 = vsub.f32 0.0, %v1179_v57  ;;  %v4260_v4 = vadd.f32 %v2639_v45, %v1154_v59  ;;  %v4262_v60 = vpop.f32.mrb[11].mxu0 }
 0x803   :  { %v1182_v6 = vsub.f32 0.0, %v1178_v62  ;;  %v4264_v8 = vadd.f32 %v2639_v45, %v1153_v63 }
 0x804   :  { %v1188_v9 = vmul.f32 1.442695, %v1183_v58  ;;  %v1181_v12 = vand.u32 2147483647, %v4260_v4 }
 0x805   :  { %v1186_v13 = vmul.f32 1.442695, %v1182_v6  ;;  %v1180_v2 = vand.u32 2147483647, %v4264_v8  ;;  %v4268_v15 = vpop.f32.mrb[12].mxu0  ;;  %vm1172_vm10 = vcmp.ne.f32.partialorder %v4264_v8, %v4264_v8 }
 0x806   :  { %3669 = vpow2.f32 %v1188_v9  ;;  %v1185_v5 = vsub.f32 0.0, %v1181_v12  ;;  %v4270_v16 = vpop.f32.mrb[13].mxu0  ;;  %v1166_v12 = vmax.f32 %v4252_v52, 0.0 }
 0x807   :  { %3671 = vpow2.f32 %v1186_v13  ;;  %v1184_v17 = vsub.f32 0.0, %v1180_v2 }
 0x808   :  { %v1192_v18 = vmul.f32 1.442695, %v1185_v5 }
 0x809   :  { %v1190_v19 = vmul.f32 1.442695, %v1184_v17 }
 0x80a   :  { %3673 = vpow2.f32 %v1192_v18  ;;  %v1169_v18 = vmax.f32 %v4260_v4, 0.0 }
 0x80b   :  { %3675 = vpow2.f32 %v1190_v19 }
 0x810   :  { %v3670_v20 = vpop.eup %3669 }
 0x811   :  { %v3672_v23 = vpop.eup %3671  ;;  %v1203_v24 = vadd.f32 1.0, %v3670_v20  ;;  %v1206_v32 = vmul.f32 -0.5, %v3670_v20  ;;  %v1209_v39 = vand.u32 2147483647, %v3670_v20 }
 0x812   :  { %v1194_v26 = vadd.f32 1.0, %v3672_v23  ;;  %v1197_v36 = vmul.f32 -0.5, %v3672_v23  ;;  %v1200_v46 = vand.u32 2147483647, %v3672_v23 }
 0x813   :  { %3677 = vlog2.f32 %v1203_v24  ;;  %v1207_v37 = vadd.f32 1.0, %v1206_v32  ;;  %vm1210_vm15 = vcmp.lt.f32.partialorder %v1209_v39, 0.0004427343 }
 0x814   :  { %v3674_v27 = vpop.eup %3673  ;;  %3679 = vlog2.f32 %v1194_v26  ;;  %v1198_v43 = vadd.f32 1.0, %v1197_v36  ;;  %vm1201_vm12 = vcmp.lt.f32.partialorder %v1200_v46, 0.0004427343 }
 0x815   :  { %v3676_v29 = vpop.eup %3675  ;;  %v1221_v30 = vadd.f32 1.0, %v3674_v27  ;;  %v1224_v40 = vmul.f32 -0.5, %v3674_v27  ;;  %v1208_v59 = vmul.f32 %v3670_v20, %v1207_v37  ;;  %v1227_v58 = vand.u32 2147483647, %v3674_v27 }
 0x816   :  { %v1212_v34 = vadd.f32 1.0, %v3676_v29  ;;  %v1215_v45 = vmul.f32 -0.5, %v3676_v29  ;;  %v1199_v63 = vmul.f32 %v3672_v23, %v1198_v43  ;;  %v1218_v13 = vand.u32 2147483647, %v3676_v29 }
 0x817   :  { %3681 = vlog2.f32 %v1221_v30  ;;  %v1225_v61 = vadd.f32 1.0, %v1224_v40  ;;  %v1168_v23 = vmax.f32 %v4264_v8, 0.0  ;;  %vm1228_vm11 = vcmp.lt.f32.partialorder %v1227_v58, 0.0004427343 }
 0x818   :  { %3683 = vlog2.f32 %v1212_v34  ;;  %v1216_v6 = vadd.f32 1.0, %v1215_v45 }
 0x819   :  { %v1226_v26 = vmul.f32 %v3674_v27, %v1225_v61 }
 0x81a   :  { %v1217_v32 = vmul.f32 %v3676_v29, %v1216_v6 }
 0x81d   :  { %v3678_v48 = vpop.eup %3677 }
 0x81e   :  { %v3680_v54 = vpop.eup %3679  ;;  %v1205_v57 = vmul.f32 0.6931472, %v3678_v48 }
 0x81f   :  { %v1196_v62 = vmul.f32 0.6931472, %v3680_v54 }
 0x820   :  { %v1211_v9 = vsel %vm1210_vm15, %v1208_v59, %v1205_v57  ;;  %vm1219_vm15 = vcmp.lt.f32.partialorder %v1218_v13, 0.0004427343  ;;  %v1444_v13 = vld [vmem:[#allocation5 + $0x98] sm:$0xff] }
 0x821   :  { %v3682_v2 = vpop.eup %3681  ;;  %v1231_v5 = vadd.f32 %v1211_v9, %v1167_v49  ;;  %v1202_v17 = vsel %vm1201_vm12, %v1199_v63, %v1196_v62  ;;  %vm1173_vm12 = vcmp.ne.f32.partialorder %v4260_v4, %v4260_v4 }
 0x822   :  { %v3684_v19 = vpop.eup %3683  ;;  %v1230_v20 = vadd.f32 %v1202_v17, %v1166_v12  ;;  %v1223_v24 = vmul.f32 0.6931472, %v3682_v2 }
 0x823   :  { %v1214_v30 = vmul.f32 0.6931472, %v3684_v19  ;;  %v1235_v34 = vsel %vm1171_vm14, %v4250_v50, %v1231_v5 }
 0x824   :  { %v1229_v36 = vsel %vm1228_vm11, %v1226_v26, %v1223_v24  ;;  %3685 = vtanh.f32 %v1235_v34  ;;  %v1234_v37 = vsel %vm1170_vm13, %v4252_v52, %v1230_v20  ;;  %vm2649_vm11 = vmneg %vm3956_vm3  ;;  %v1445_v20 = vld [vmem:[#allocation5 + $0xa0] sm:$0xff]  ;;  %v1446_v24 = vld [vmem:[#allocation5 + $0xa8] sm:$0xff]  ;;  %vm4586_vm3 = vcmask 15360  }
 0x825   :  { %v1233_v39 = vadd.f32 %v1229_v36, %v1169_v18  ;;  %v1220_v40 = vsel %vm1219_vm15, %v1217_v32, %v1214_v30  ;;  %3687 = vtanh.f32 %v1234_v37  ;;  %v1447_v30 = vld [vmem:[#allocation5 + $0xb0] sm:$0xff]  ;;  %v1448_v32 = vld [vmem:[#allocation5 + $0xb8] sm:$0xff]  ;;  %v1449_v36 = vld [vmem:[#allocation5 + $0xc0] sm:$0xff] }
 0x826   :  { %v1232_v27 = vadd.f32 %v1220_v40, %v1168_v23  ;;  %v3505_v23 = vpack.c.bf16 %v1446_v24, %v1445_v20  ;;  %v3509_v34 = vpack.c.bf16 %v1448_v32, %v1447_v30  ;;  %v1450_v37 = vld [vmem:[#allocation5 + $0xc8] sm:$0xff]  ;;  %v1452_v40 = vld [vmem:[#allocation5 + $0xd8] sm:$0xff]  ;;  %vm4590_vm14 = vmmov %vm4586_vm3 }
 0x827   :  { %v1237_v29 = vsel %vm1173_vm12, %v4260_v4, %v1233_v39  ;;  %v3513_v1 = vpack.c.bf16 %v1450_v37, %v1449_v36  ;;  %v1451_v39 = vld [vmem:[#allocation5 + $0xd0] sm:$0xff]  ;;  %vm4591_vm13 = vmmov %vm4586_vm3 }
 0x828   :  { %3689 = vtanh.f32 %v1237_v29  ;;  %v1236_v43 = vsel %vm1172_vm10, %v4264_v8, %v1232_v27  ;;  %vm2647_vm10 = vmneg %vm3933_vm1  ;;  %v1453_v27 = vld [vmem:[#allocation5 + $0xe0] sm:$0xff]  ;;  %v1454_v29 = vld [vmem:[#allocation5 + $0xe8] sm:$0xff] }
 0x829   :  { %3691 = vtanh.f32 %v1236_v43  ;;  %v3521_v43 = vpack.c.bf16 %v1454_v29, %v1453_v27  ;;  %vm2653_vm1 = vmneg %vm3999_vm6 }
 0x82a   :  { %vm4589_vm6 = vmmov %vm4586_vm3 }
 0x82b   :  { %vm4595_vm15 = vmmov %vm4586_vm3 }
 0x82c   :  { %vm4596_vm12 = vmmov %vm4586_vm3 }
 0x82e   :  { %v3686_v45 = vpop.eup %3685 }
 0x82f   :  { %v3688_v46 = vpop.eup %3687  ;;  %v1243_v48 = vmul.f32 %v3686_v45, %v4250_v50  ;;  %v1455_v45 = vld [vmem:[#allocation5 + $0xf0] sm:$0xff] }
 0x830   :  { %v1242_v49 = vmul.f32 %v3688_v46, %v4252_v52  ;;  %v1456_v46 = vld [vmem:[#allocation5 + $0xf8] sm:$0xff] }
 0x831   :  { %v4294_v54 = vadd.f32 %v4258_v3, %v1243_v48  ;;  %v3525_v48 = vpack.c.bf16 %v1456_v46, %v1455_v45 }
 0x832   :  { %v3690_v57 = vpop.eup %3689  ;;  %v1436_v59 = vadd.f32 %v4262_v60, %v1242_v49  ;;  %v1443_v60 = vld [vmem:[#allocation5 + $0x90] sm:$0xff]  ;;  %v1668_v49 = vld [vmem:[#allocation5 + $0x100] sm:$0xff] }
 0x833   :  { %v3692_v61 = vpop.eup %3691  ;;  %v1458_v62 = vrot.slane %v4294_v54, 7  ;;  %v1656_v63 = vrot.slane %v4294_v54, 1  ;;  %v1245_v58 = vmul.f32 %v3690_v57, %v4260_v4  ;;  %v3501_v17 = vpack.c.bf16 %v1444_v13, %v1443_v60  ;;  %v1669_v57 = vld [vmem:[#allocation5 + $0x108] sm:$0xff]  ;;  %v1676_v13 = vld [vmem:[#allocation5 + $0x140] sm:$0xff] }
 0x834   :  { %v1457_v6 = vrot.slane %v1436_v59, 7  ;;  %v1655_v9 = vrot.slane %v1436_v59, 1  ;;  %v1244_v12 = vmul.f32 %v3692_v61, %v4264_v8  ;;  %v1670_v61 = vld [vmem:[#allocation5 + $0x110] sm:$0xff] }
 0x835   :  { %v4302_v50 = vadd.f32 %v4268_v15, %v1245_v58  ;;  %v1672_v58 = vld [vmem:[#allocation5 + $0x120] sm:$0xff] }
 0x836   :  { %v4305_v52 = vadd.f32 %v4270_v16, %v1244_v12  ;;  %v1463_v3 = vsel %vm173_vm0, %v1457_v6, %v1458_v62  ;;  %v4311_v2 = vsel %vm393_vm4, %v1655_v9, %v1656_v63  ;;  %v1674_v12 = vld [vmem:[#allocation5 + $0x130] sm:$0xff] }
 0x837   :  { %v1460_v4 = vrot.slane %v4302_v50, 7  ;;  %v1658_v8 = vrot.slane %v4302_v50, 1 }
 0x838   :  { %v1459_v15 = vrot.slane %v4305_v52, 7  ;;  %v1657_v16 = vrot.slane %v4305_v52, 1 }
 0x839   :  { %v1464_v5 = vsel %vm173_vm0, %v1460_v4, %v1457_v6  ;;  %v4325_v18 = vsel %vm393_vm4, %v1658_v8, %v1655_v9  ;;  %v1673_v6 = vld [vmem:[#allocation5 + $0x128] sm:$0xff] }
 0x83a   :  { %3135 = vmatprep.mubr.msk.f32.mxu0 %vm2647_vm10, %v1464_v5  ;;  %v1462_v14 = vsel %vm173_vm0, %v1458_v62, %v1459_v15  ;;  %v1461_v19 = vsel %vm173_vm0, %v1459_v15, %v1460_v4  ;;  %v4333_v26 = vsel %vm393_vm4, %v1656_v63, %v1657_v16  ;;  %v4337_v33 = vsel %vm393_vm4, %v1657_v16, %v1658_v8  ;;  %v1671_v62 = vld [vmem:[#allocation5 + $0x118] sm:$0xff]  ;;  %v1677_v4 = vld [vmem:[#allocation5 + $0x148] sm:$0xff]  ;;  %v1680_v16 = vld [vmem:[#allocation5 + $0x160] sm:$0xff] }
 0x83b   :  { %3136 = vmatmul.mubr.f32.vlgmr.msra.gmra.mrb[14].mxu0 %v1463_v3  ;;  %v3533_v63 = vpack.c.bf16 %v1671_v62, %v1670_v61  ;;  %v3537_v9 = vpack.c.bf16 %v1673_v6, %v1672_v58  ;;  %v1675_v3 = vld [vmem:[#allocation5 + $0x138] sm:$0xff]  ;;  %v3545_v8 = vpack.c.bf16 %v1677_v4, %v1676_v13  ;;  %v1681_v5 = vld [vmem:[#allocation5 + $0x168] sm:$0xff]  ;;  %vm2651_vm0 = vmneg %vm3988_vm5  ;;  %vm4587_vm4 = vcmask 1041408  }
 0x83c   :  { %3500 = vmatpush3.bf16.msra.mxu0 %v4242_v42  ;;  %3138 = vmatprep.mubr.msk.f32.mxu0 %vm2649_vm11, %v1462_v14  ;;  %v3517_v42 = vpack.c.bf16 %v1452_v40, %v1451_v39  ;;  %v3541_v60 = vpack.c.bf16 %v1675_v3, %v1674_v12  ;;  %v1679_v15 = vld [vmem:[#allocation5 + $0x158] sm:$0xff]  ;;  %vm4588_vm5 = vmmov %vm4587_vm4  ;;  %v2488_v58 = vld [vmem:[%s4566_s10 + $0x28] sm:$0xff] }
 0x83d   :  { %3502 = vmatprep.subr.bf16.mxu0 %v3501_v17  ;;  %v1683_v14 = vld [vmem:[#allocation5 + $0x178] sm:$0xff]  ;;  %v3721_v13 = vld [vmem:[%s4577_s7 + $0x10] sm:$0xff]  ;;  %vm4597_vm10 = vmmov %vm4586_vm3 }
 0x83e   :  { %v2486_v62 = vld [vmem:[%s4566_s10 + $0x18] sm:$0xff] }
 0x83f   :  { %3139 = vmatmul.mubr.f32.gmra.mrb[16].mxu0 %v1461_v19  ;;  %v3719_v19 = vld [vmem:[%s4577_s7] sm:$0xff]  ;;  %v2490_v12 = vld [vmem:[%s4566_s10 + $0x38] sm:$0xff] }
 0x840   :  { %3504 = vmatpush3.bf16.msra.mxu0 %v3501_v17  ;;  %3173 = vmatprep.mubr.f32.mxu0 %v1436_v59  ;;  %v3529_v59 = vpack.c.bf16 %v1669_v57, %v1668_v49  ;;  %v1682_v17 = vld [vmem:[#allocation5 + $0x170] sm:$0xff]  ;;  %v3722_v4 = vld [vmem:[%s4577_s7 + $0x18] sm:$0xff] }
 0x841   :  { %3506 = vmatprep.subr.bf16.mxu0 %v3505_v23 }
 0x844   :  { %3508 = vmatpush3.bf16.msra.mxu0 %v3505_v23 }
 0x845   :  { %3510 = vmatprep.subr.bf16.mxu0 %v3509_v34 }
 0x848   :  { %3512 = vmatpush3.bf16.msra.mxu0 %v3509_v34 }
 0x849   :  { %3514 = vmatprep.subr.bf16.mxu0 %v3513_v1 }
 0x84c   :  { %3516 = vmatpush3.bf16.msra.mxu0 %v3513_v1 }
 0x84d   :  { %3518 = vmatprep.subr.bf16.mxu0 %v3517_v42 }
 0x850   :  { %3520 = vmatpush3.bf16.msra.mxu0 %v3517_v42 }
 0x851   :  { %3522 = vmatprep.subr.bf16.mxu0 %v3521_v43 }
 0x854   :  { %3524 = vmatpush3.bf16.msra.mxu0 %v3521_v43 }
 0x855   :  { %3526 = vmatprep.subr.bf16.mxu0 %v3525_v48 }
 0x858   :  { %3528 = vmatpush3.bf16.msra.mxu0 %v3525_v48 }
 0x859   :  { %3530 = vmatprep.subr.bf16.mxu0 %v3529_v59 }
 0x85b   :  { %3174 = vmatmul.mubr.f32.vlgmr.msra.gmra.mrb[14].mxu0 %v4294_v54  ;;  %v1678_v54 = vld [vmem:[#allocation5 + $0x150] sm:$0xff] }
 0x85c   :  { %3176 = vmatprep.mubr.f32.mxu0 %v4305_v52  ;;  %3532 = vmatpush3.bf16.msra.mxu0 %v3529_v59  ;;  %v3549_v52 = vpack.c.bf16 %v1679_v15, %v1678_v54 }
 0x85d   :  { %3534 = vmatprep.subr.bf16.mxu0 %v3533_v63 }
 0x85f   :  { %3177 = vmatmul.mubr.f32.gmra.mrb[16].mxu0 %v4302_v50  ;;  %v3553_v50 = vpack.c.bf16 %v1681_v5, %v1680_v16 }
 0x860   :  { %3536 = vmatpush3.bf16.msra.mxu0 %v3533_v63  ;;  %3211 = vmatprep.mubr.f32.mxu0 %v4311_v2  ;;  %v3557_v2 = vpack.c.bf16 %v1683_v14, %v1682_v17  ;;  %v2669_v17 = vld [vmem:[%s4565_s9] ss:$0 sm:$0xff] }
 0x861   :  { %3538 = vmatprep.subr.bf16.mxu0 %v3537_v9 }
 0x864   :  { %3540 = vmatpush3.bf16.msra.mxu0 %v3537_v9  ;;  %v2489_v9 = vld [vmem:[%s4566_s10 + $0x30] sm:$0xff] }
 0x865   :  { %3542 = vmatprep.subr.bf16.mxu0 %v3541_v60  ;;  %v3633_v3 = vpack.c.bf16 %v2490_v12, %v2489_v9 }
 0x868   :  { %3544 = vmatpush3.bf16.msra.mxu0 %v3541_v60  ;;  %v3720_v60 = vld [vmem:[%s4577_s7 + $0x8] sm:$0xff] }
 0x869   :  { %3546 = vmatprep.subr.bf16.mxu0 %v3545_v8 }
 0x86c   :  { %3548 = vmatpush3.bf16.msra.mxu0 %v3545_v8 }
 0x86d   :  { %3550 = vmatprep.subr.bf16.mxu0 %v3549_v52 }
 0x870   :  { %3552 = vmatpush3.bf16.msra.mxu0 %v3549_v52 }
 0x871   :  { %3554 = vmatprep.subr.bf16.mxu0 %v3553_v50 }
 0x874   :  { %3556 = vmatpush3.bf16.msra.mxu0 %v3553_v50 }
 0x875   :  { %3558 = vmatprep.subr.bf16.mxu0 %v3557_v2 }
 0x878   :  { %3560 = vmatpush3.bf16.msra.mxu0 %v3557_v2 }
 0x87b   :  { %3212 = vmatmul.mubr.msk.f32.vlgmr.msra.gmra.mrb[14].mxu0 %vm2651_vm0, %v4333_v26 }
 0x87c   :  { %3214 = vmatprep.mubr.f32.mxu0 %v4337_v33 }
 0x87f   :  { %3215 = vmatmul.mubr.msk.f32.gmra.mrb[16].mxu0 %vm2653_vm1, %v4325_v18 }
 0x880   :  { %3351 = vmatprep.mubr.msk.f32.mxu0 %vm190_vm2, %v3719_v19 }
 0x94e   :  { %v3213_v20 = vpop.f32.mrb[14].mxu0 }
 0x94f   :  { %v1750_v24 = vpop.f32.mrb[15].mxu0 }
 0x950   :  { %v3562_v23 = vpack.c.bf16 %v3213_v20, %v1750_v24 }
 0x952   :  { %v3216_v0 = vpop.f32.mrb[16].mxu0  ;;  %3563 = vmatpush3.bf16.msra.mxu1 %v3562_v23 }
 0x953   :  { %v1760_v30 = vpop.f32.mrb[17].mxu0  ;;  %3564 = vmatprep.subr.bf16.mxu1 %v3799_v10 }
 0x954   :  { %v3565_v26 = vpack.c.bf16 %v3216_v0, %v1760_v30 }
 0x956   :  { %3566 = vmatpush3.bf16.msra.mxu1 %v3565_v26 }
 0x957   :  { %3567 = vmatprep.subr.bf16.mxu1 %v3799_v10 }
 0x959   :  { %3226 = vmatmul.mubr.msk.f32.vlgmr.msra.gmra.mrb[16].mxu1 %vm513_vm8, %v4038_v21 }
 0x95a   :  { %3569 = vmatpush3.bf16.msra.mxu1 %v4040_v22  ;;  %3260 = vmatprep.mubr.msk.f32.mxu1 %vm3800_vm7, %v3801_v11 }
 0x95b   :  { %3570 = vmatprep.subr.bf16.mxu1 %v3799_v10 }
 0x95e   :  { %3572 = vmatpush3.bf16.msra.mxu1 %v4052_v25 }
 0x95f   :  { %3573 = vmatprep.subr.bf16.mxu1 %v3799_v10 }
 0x962   :  { %3575 = vmatpush3.bf16.msra.mxu1 %v4064_v28 }
 0x963   :  { %3576 = vmatprep.subr.bf16.mxu1 %v3799_v10 }
 0x966   :  { %3578 = vmatpush3.bf16.msra.mxu1 %v4074_v31 }
 0x967   :  { %3579 = vmatprep.subr.bf16.mxu1 %v3799_v10 }
 0x96a   :  { %3581 = vmatpush3.bf16.msra.mxu1 %v4084_v35 }
 0x96b   :  { %3582 = vmatprep.subr.bf16.mxu1 %v3799_v10 }
 0x96e   :  { %3584 = vmatpush3.bf16.msra.mxu1 %v4094_v38 }
 0x96f   :  { %3585 = vmatprep.subr.bf16.mxu1 %v3799_v10 }
 0x972   :  { %3587 = vmatpush3.bf16.msra.mxu1 %v4104_v41 }
 0x973   :  { %3588 = vmatprep.subr.bf16.mxu1 %v3799_v10 }
 0x976   :  { %3590 = vmatpush3.bf16.msra.mxu1 %v4114_v44 }
 0x977   :  { %3263 = vmatprep.subr.mxu1 %v3801_v11 }
 0xa2c   :  { %v1839_v7 = vpop.f32.mrb[16].mxu1 }
 0xa2d   :  { %v3227_v18 = vpop.f32.mrb[17].mxu1  ;;  %3261 = vmatmul.mubr.f32.vlgmr.msra.gmra.mrb[18].mxu1 %v1839_v7 }
 0xa2e   :  { %3264 = vmatpush3.msra.mxu1 %v4124_v47  ;;  %3265 = vmatprep.mubr.msk.f32.mxu1 %vm3800_vm7, %v3801_v11 }
 0xb00   :  { %v1909_v33 = vpop.f32.mrb[18].mxu1 }
 0xb01   :  { %v1913_v32 = vmul.f32 0.00390625, %v1909_v33  ;;  %v3262_v34 = vpop.f32.mrb[19].mxu1 }
 0xb03   :  { %3266 = vmatmul.mubr.msk.f32.vlgmr.msra.gmra.mrb[20].mxu1 %vm658_vm9, %v1913_v32 }
 0xb04   :  { %3270 = vmatprep.mubr.msk.f32.mxu1 %vm4586_vm3, %v4131_v51 }
 0xbd6   :  { %v1983_v36 = vpop.f32.mrb[20].mxu1 }
 0xbd7   :  { %v3267_v37 = vpop.f32.mrb[21].mxu1  ;;  %3268 = vmatprep.subr.msk.mxu1 %vm4587_vm4, %v1983_v36 }
 0xbd8   :  { %3269 = vmatpush3.msk.msra.mxu1 %vm4588_vm5, %v1983_v36 }
 0xbd9   :  { %3271 = vmatmul.mubr.msk.f32.vlgmr.msra.gmra.mrb[22].mxu1 %vm4589_vm6, %v4138_v53  ;;  %3591 = vmatprep.subr.bf16.mxu1 %v3799_v10 }
 0xbda   :  { %3273 = vmatprep.mubr.msk.f32.mxu1 %vm4590_vm14, %v4144_v55 }
 0xbdd   :  { %3274 = vmatmul.mubr.msk.f32.gmra.mrb[24].mxu1 %vm4591_vm13, %v4155_v56 }
 0xbde   :  { %3284 = vmatprep.mubr.msk.f32.mxu1 %vm3800_vm7, %v3801_v11 }
 0xcac   :  { %v3272_v47 = vpop.f32.mrb[22].mxu1 }
 0xcad   :  { %v4394_v1 = vsub.f32 %v3213_v20, %v3272_v47  ;;  %v2056_v39 = vpop.f32.mrb[23].mxu1 }
 0xcae   :  { %v4396_v40 = vsub.f32 %v1750_v24, %v2056_v39 }
 0xcaf   :  { %v2080_v42 = vmul.f32 %v4394_v1, %v4394_v1 }
 0xcb0   :  { %v2079_v27 = vmul.f32 %v4396_v40, %v4396_v40  ;;  %v3275_v29 = vpop.f32.mrb[24].mxu1 }
 0xcb1   :  { %v4402_v43 = vsub.f32 %v3216_v0, %v3275_v29  ;;  %v2066_v45 = vpop.f32.mrb[25].mxu1 }
 0xcb2   :  { %v3592_v46 = vpack.c.bf16 %v2080_v42, %v2079_v27  ;;  %v4404_v48 = vsub.f32 %v1760_v30, %v2066_v45 }
 0xcb3   :  { %v2082_v49 = vmul.f32 %v4402_v43, %v4402_v43 }
 0xcb4   :  { %v2081_v57 = vmul.f32 %v4404_v48, %v4404_v48  ;;  %3593 = vmatpush3.bf16.msra.mxu1 %v3592_v46 }
 0xcb5   :  { %3594 = vmatprep.subr.bf16.mxu1 %v3799_v10 }
 0xcb6   :  { %v3595_v59 = vpack.c.bf16 %v2082_v49, %v2081_v57 }
 0xcb8   :  { %3596 = vmatpush3.bf16.msra.mxu1 %v3595_v59 }
 0xcb9   :  { %3597 = vmatprep.subr.bf16.mxu1 %v3799_v10 }
 0xcbb   :  { %3285 = vmatmul.mubr.msk.f32.vlgmr.msra.gmra.mrb[26].mxu1 %vm513_vm8, %v4038_v21  ;;  %vm4592_vm8 = vmmov %vm4586_vm3 }
 0xcbc   :  { %3599 = vmatpush3.bf16.msra.mxu1 %v4040_v22  ;;  %3319 = vmatprep.mubr.msk.f32.mxu1 %vm3800_vm7, %v3801_v11 }
 0xcbd   :  { %3600 = vmatprep.subr.bf16.mxu1 %v3799_v10 }
 0xcc0   :  { %3602 = vmatpush3.bf16.msra.mxu1 %v4052_v25  ;;  %v2226_v25 = vld [vmem:[%s4564_s8] sm:$0xff] }
 0xcc1   :  { %3603 = vmatprep.subr.bf16.mxu1 %v3799_v10 }
 0xcc4   :  { %3605 = vmatpush3.bf16.msra.mxu1 %v4064_v28 }
 0xcc5   :  { %3606 = vmatprep.subr.bf16.mxu1 %v3799_v10 }
 0xcc8   :  { %3608 = vmatpush3.bf16.msra.mxu1 %v4074_v31 }
 0xcc9   :  { %3609 = vmatprep.subr.bf16.mxu1 %v3799_v10 }
 0xccc   :  { %3611 = vmatpush3.bf16.msra.mxu1 %v4084_v35 }
 0xccd   :  { %3612 = vmatprep.subr.bf16.mxu1 %v3799_v10 }
 0xcd0   :  { %3614 = vmatpush3.bf16.msra.mxu1 %v4094_v38 }
 0xcd1   :  { %3615 = vmatprep.subr.bf16.mxu1 %v3799_v10 }
 0xcd4   :  { %3617 = vmatpush3.bf16.msra.mxu1 %v4104_v41  ;;  %v2484_v41 = vld [vmem:[%s4566_s10 + $0x8] sm:$0xff] }
 0xcd5   :  { %3618 = vmatprep.subr.bf16.mxu1 %v3799_v10 }
 0xcd8   :  { %3620 = vmatpush3.bf16.msra.mxu1 %v4114_v44  ;;  %v2485_v44 = vld [vmem:[%s4566_s10 + $0x10] sm:$0xff] }
 0xcd9   :  { %3322 = vmatprep.subr.mxu1 %v3801_v11  ;;  %v3625_v63 = vpack.c.bf16 %v2486_v62, %v2485_v44 }
 0xd8e   :  { %v2149_v21 = vpop.f32.mrb[26].mxu1 }
 0xd8f   :  { %v3286_v22 = vpop.f32.mrb[27].mxu1  ;;  %3320 = vmatmul.mubr.f32.vlgmr.msra.gmra.mrb[28].mxu1 %v2149_v21 }
 0xd90   :  { %3324 = vmatprep.mubr.msk.f32.mxu1 %vm3800_vm7, %v3801_v11  ;;  %3323 = vmatpush3.msra.mxu1 %v2226_v25  ;;  %v2483_v11 = vld [vmem:[%s4566_s10] sm:$0xff]  ;;  %vm4593_vm7 = vmmov %vm4587_vm4 }
 0xd91   :  { %v3621_v61 = vpack.c.bf16 %v2484_v41, %v2483_v11 }
 0xd93   :  { %3622 = vmatprep.subr.bf16.mxu0 %v3621_v61 }
 0xd94   :  { %3624 = vmatpush3.bf16.msra.mxu0 %v3621_v61 }
 0xd95   :  { %3626 = vmatprep.subr.bf16.mxu0 %v3625_v63 }
 0xd98   :  { %3628 = vmatpush3.bf16.msra.mxu0 %v3625_v63 }
 0xe62   :  { %v2219_v28 = vpop.f32.mrb[28].mxu1 }
 0xe63   :  { %v2223_v31 = vmul.f32 0.00390625, %v2219_v28  ;;  %v3321_v35 = vpop.f32.mrb[29].mxu1 }
 0xe65   :  { %v2224_v38 = vadd.f32 1e-05, %v2223_v31 }
 0xe67   :  { %3693 = vrsqrt.f32 %v2224_v38 }
 0xe71   :  { %v3694_v10 = vpop.eup %3693 }
 0xe72   :  { %3325 = vmatmul.mubr.msk.f32.vlgmr.msra.gmra.mrb[30].mxu1 %vm658_vm9, %v3694_v10  ;;  %vm4594_vm9 = vmmov %vm4587_vm4 }
 0xe73   :  { %3329 = vmatprep.mubr.msk.f32.mxu1 %vm4592_vm8, %v4131_v51  ;;  %v2487_v51 = vld [vmem:[%s4566_s10 + $0x20] sm:$0xff] }
 0xe74   :  { %v3629_v6 = vpack.c.bf16 %v2488_v58, %v2487_v51 }
 0xe76   :  { %3630 = vmatprep.subr.bf16.mxu0 %v3629_v6 }
 0xe77   :  { %3632 = vmatpush3.bf16.msra.mxu0 %v3629_v6 }
 0xe78   :  { %3634 = vmatprep.subr.bf16.mxu0 %v3633_v3 }
 0xe7b   :  { %3636 = vmatpush3.bf16.msra.mxu0 %v3633_v3 }
 0xe7e   :  { %3352 = vmatmul.mubr.msk.f32.vlgmr.msra.gmra.mrb[18].mxu0 %vm190_vm2, %v3720_v60 }
 0xe7f   :  { %3354 = vmatprep.mubr.msk.f32.mxu0 %vm190_vm2, %v3721_v13 }
 0xe82   :  { %3355 = vmatmul.mubr.msk.f32.gmra.mrb[20].mxu0 %vm190_vm2, %v3722_v4 }
 0xf45   :  { %v2296_v8 = vpop.f32.mrb[30].mxu1 }
 0xf46   :  { %v3326_v54 = vpop.f32.mrb[31].mxu1  ;;  %3327 = vmatprep.subr.msk.mxu1 %vm4593_vm7, %v2296_v8 }
 0xf47   :  { %3328 = vmatpush3.msk.msra.mxu1 %vm4594_vm9, %v2296_v8 }
 0xf48   :  { %3330 = vmatmul.mubr.msk.f32.vlgmr.msra.gmra.mrb[32].mxu1 %vm4595_vm15, %v4138_v53 }
 0xf49   :  { %3332 = vmatprep.mubr.msk.f32.mxu1 %vm4596_vm12, %v4144_v55 }
 0xf4c   :  { %3333 = vmatmul.mubr.msk.f32.gmra.mrb[34].mxu1 %vm4597_vm10, %v4155_v56 }
 0xf51   :  { %v4484_v15 = vpop.f32.mrb[18].mxu0 }
 0xf52   :  { %v4486_v52 = vpop.f32.mrb[19].mxu0 }
 0xf55   :  { %v4488_v16 = vpop.f32.mrb[20].mxu0 }
 0xf56   :  { %v4490_v5 = vpop.f32.mrb[21].mxu0 }
0x101b   :  { %v3331_v50 = vpop.f32.mrb[32].mxu1 }
0x101c   :  { %v2389_v53 = vmul.f32 %v3331_v50, %v4394_v1  ;;  %v2369_v14 = vpop.f32.mrb[33].mxu1 }
0x101d   :  { %v2388_v55 = vmul.f32 %v2369_v14, %v4396_v40 }
0x101e   :  { %v4497_v2 = vadd.f32 %v2669_v17, %v2389_v53 }
0x101f   :  { %v4499_v56 = vadd.f32 %v2669_v17, %v2388_v55  ;;  %v3334_v19 = vpop.f32.mrb[34].mxu1 }
0x1020   :  { %v2416_v20 = vand.u32 2147483647, %v4497_v2  ;;  %v2391_v24 = vmul.f32 %v3334_v19, %v4402_v43  ;;  %v2379_v23 = vpop.f32.mrb[35].mxu1  ;;  %v2404_v10 = vmax.f32 %v4497_v2, 0.0  ;;  %vm2408_vm2 = vcmp.ne.f32.partialorder %v4497_v2, %v4497_v2 }
0x1021   :  { %v2415_v0 = vand.u32 2147483647, %v4499_v56  ;;  %v2390_v30 = vmul.f32 %v2379_v23, %v4404_v48  ;;  %v2403_v9 = vmax.f32 %v4499_v56, 0.0  ;;  %vm2407_vm1 = vcmp.ne.f32.partialorder %v4499_v56, %v4499_v56 }
0x1022   :  { %v2420_v26 = vsub.f32 0.0, %v2416_v20  ;;  %v4505_v7 = vadd.f32 %v2669_v17, %v2391_v24 }
0x1023   :  { %v2419_v18 = vsub.f32 0.0, %v2415_v0  ;;  %v4507_v33 = vadd.f32 %v2669_v17, %v2390_v30 }
0x1024   :  { %v2425_v32 = vmul.f32 1.442695, %v2420_v26  ;;  %v2418_v34 = vand.u32 2147483647, %v4505_v7  ;;  %v2406_v4 = vmax.f32 %v4505_v7, 0.0  ;;  %vm2410_vm5 = vcmp.ne.f32.partialorder %v4505_v7, %v4505_v7 }
0x1025   :  { %v2423_v36 = vmul.f32 1.442695, %v2419_v18  ;;  %v2417_v37 = vand.u32 2147483647, %v4507_v33  ;;  %v2405_v53 = vmax.f32 %v4507_v33, 0.0  ;;  %vm2409_vm6 = vcmp.ne.f32.partialorder %v4507_v33, %v4507_v33 }
0x1026   :  { %3695 = vpow2.f32 %v2425_v32  ;;  %v2422_v47 = vsub.f32 0.0, %v2418_v34 }
0x1027   :  { %3697 = vpow2.f32 %v2423_v36  ;;  %v2421_v1 = vsub.f32 0.0, %v2417_v37  ;;  %v2674_v37 = vld [vmem:[%s4567_s11] ss:$0 sm:$0xff]  ;;  %s3767_s11 = scalar_lea.vmem %s2601_s22, 512 }
0x1028   :  { %v2429_v39 = vmul.f32 1.442695, %v2422_v47  ;;  %p3768_p2 = scmp.ne.s32.totalorder %s2601_s22, %s3767_s11  ;;  %p3773_p4 = scmp.lt.s32.totalorder %s3767_s11, %s3767_s11 }
0x1029   :  { %v2427_v40 = vmul.f32 1.442695, %v2421_v1 }
0x102a   :  { %3699 = vpow2.f32 %v2429_v39  ;;  %p3774_p5 = por %p3773_p4, %p3772_p3 }
0x102b   :  { %3701 = vpow2.f32 %v2427_v40 }
0x102c   :  { %p3775_p6 = pnand %p3774_p5, %p3768_p2 }
0x1030   :  { %v3696_v42 = vpop.eup %3695 }
0x1031   :  { %v3698_v27 = vpop.eup %3697  ;;  %v2440_v29 = vadd.f32 1.0, %v3696_v42  ;;  %v2443_v49 = vmul.f32 -0.5, %v3696_v42  ;;  %v2446_v22 = vand.u32 2147483647, %v3696_v42 }
0x1032   :  { %v2431_v43 = vadd.f32 1.0, %v3698_v27  ;;  %v2434_v59 = vmul.f32 -0.5, %v3698_v27  ;;  %v2437_v35 = vand.u32 2147483647, %v3698_v27 }
0x1033   :  { %3703 = vlog2.f32 %v2440_v29  ;;  %v2444_v21 = vadd.f32 1.0, %v2443_v49  ;;  %vm2447_vm11 = vcmp.lt.f32.partialorder %v2446_v22, 0.0004427343 }
0x1034   :  { %v3700_v45 = vpop.eup %3699  ;;  %3705 = vlog2.f32 %v2431_v43  ;;  %v2435_v28 = vadd.f32 1.0, %v2434_v59  ;;  %vm2438_vm0 = vcmp.lt.f32.partialorder %v2437_v35, 0.0004427343 }
0x1035   :  { %v3702_v46 = vpop.eup %3701  ;;  %v2458_v48 = vadd.f32 1.0, %v3700_v45  ;;  %v2461_v25 = vmul.f32 -0.5, %v3700_v45  ;;  %v2445_v44 = vmul.f32 %v3696_v42, %v2444_v21  ;;  %v2464_v51 = vand.u32 2147483647, %v3700_v45 }
0x1036   :  { %v2449_v57 = vadd.f32 1.0, %v3702_v46  ;;  %v2452_v31 = vmul.f32 -0.5, %v3702_v46  ;;  %v2436_v63 = vmul.f32 %v3698_v27, %v2435_v28  ;;  %v2455_v12 = vand.u32 2147483647, %v3702_v46 }
0x1037   :  { %3707 = vlog2.f32 %v2458_v48  ;;  %v2462_v61 = vadd.f32 1.0, %v2461_v25  ;;  %vm2465_vm3 = vcmp.lt.f32.partialorder %v2464_v51, 0.0004427343 }
0x1038   :  { %3709 = vlog2.f32 %v2449_v57  ;;  %v2453_v58 = vadd.f32 1.0, %v2452_v31  ;;  %vm2456_vm4 = vcmp.lt.f32.partialorder %v2455_v12, 0.0004427343 }
0x1039   :  { %v2463_v17 = vmul.f32 %v3700_v45, %v2462_v61 }
0x103a   :  { %v2454_v55 = vmul.f32 %v3702_v46, %v2453_v58 }
0x103d   :  { %v3704_v38 = vpop.eup %3703 }
0x103e   :  { %v3706_v11 = vpop.eup %3705  ;;  %v2442_v41 = vmul.f32 0.6931472, %v3704_v38 }
0x103f   :  { %v2433_v62 = vmul.f32 0.6931472, %v3706_v11 }
0x1040   :  { %v2448_v6 = vsel %vm2447_vm11, %v2445_v44, %v2442_v41 }
0x1041   :  { %v3708_v3 = vpop.eup %3707  ;;  %v2468_v60 = vadd.f32 %v2448_v6, %v2404_v10  ;;  %v2439_v13 = vsel %vm2438_vm0, %v2436_v63, %v2433_v62 }
0x1042   :  { %v3710_v8 = vpop.eup %3709  ;;  %v2467_v54 = vadd.f32 %v2439_v13, %v2403_v9  ;;  %v2460_v50 = vmul.f32 0.6931472, %v3708_v3 }
0x1043   :  { %v2451_v14 = vmul.f32 0.6931472, %v3710_v8  ;;  %v2472_v19 = vsel %vm2408_vm2, %v4497_v2, %v2468_v60 }
0x1044   :  { %v2466_v20 = vsel %vm2465_vm3, %v2463_v17, %v2460_v50  ;;  %3711 = vtanh.f32 %v2472_v19  ;;  %v2471_v24 = vsel %vm2407_vm1, %v4499_v56, %v2467_v54 }
0x1045   :  { %v2470_v23 = vadd.f32 %v2466_v20, %v2406_v4  ;;  %v2457_v0 = vsel %vm2456_vm4, %v2454_v55, %v2451_v14  ;;  %3713 = vtanh.f32 %v2471_v24 }
0x1046   :  { %v2469_v30 = vadd.f32 %v2457_v0, %v2405_v53 }
0x1047   :  { %v2474_v26 = vsel %vm2410_vm5, %v4505_v7, %v2470_v23 }
0x1048   :  { %3715 = vtanh.f32 %v2474_v26  ;;  %v2473_v18 = vsel %vm2409_vm6, %v4507_v33, %v2469_v30 }
0x1049   :  { %3717 = vtanh.f32 %v2473_v18 }
0x104e   :  { %v3712_v32 = vpop.eup %3711 }
0x104f   :  { %v3714_v34 = vpop.eup %3713  ;;  %v2480_v36 = vmul.f32 %v3712_v32, %v4497_v2 }
0x1050   :  { %v2479_v47 = vmul.f32 %v3714_v34, %v4499_v56 }
0x1051   :  { %v2577_v1 = vadd.f32 %v4484_v15, %v2480_v36 }
0x1052   :  { %v3716_v39 = vpop.eup %3715  ;;  %v2576_v40 = vadd.f32 %v4486_v52, %v2479_v47 }
0x1053   :  { %v3718_v42 = vpop.eup %3717  ;;  %v2588_v27 = vadd.f32 %v2674_v37, %v2577_v1  ;;  %v2482_v29 = vmul.f32 %v3716_v39, %v4505_v7 }
0x1054   :  { %v2587_v43 = vadd.f32 %v2674_v37, %v2576_v40  ;;  %v2481_v45 = vmul.f32 %v3718_v42, %v4507_v33 }
0x1055   :  { %2592 = vst [vmem:[#allocation7 + $0x8] sm:$0xff] %v2588_v27  ;;  %v2579_v2 = vadd.f32 %v4488_v16, %v2482_v29 }
0x1056   :  { %2591 = vst [vmem:[#allocation7] sm:$0xff] %v2587_v43  ;;  %v2578_v56 = vadd.f32 %v4490_v5, %v2481_v45 }
0x1057   :  { %v2590_v46 = vadd.f32 %v2674_v37, %v2579_v2 }
0x1058   :  { %v2589_v15 = vadd.f32 %v2674_v37, %v2578_v56 }
0x1059   :  { %2594 = vst [vmem:[#allocation7 + $0x18] sm:$0xff] %v2590_v46 }
0x105a   :  { %2593 = vst [vmem:[#allocation7 + $0x10] sm:$0xff] %v2589_v15 }
0x105b   :  { %3778 = shalt.err (!%p3775_p6)
}
0x105c   :  { %s3779_s13 = scalar_lea.hbm %s4572_s16, 512 }
0x105d   :  { %p3780_p7 = scmp.ne.s32.totalorder %s4572_s16, %s3779_s13  ;;  %p3783_p8 = scmp.lt.u32.totalorder %s3779_s13, %s4572_s16 }
0x105f   :  { %p3785_p9 = pnand %p3783_p8, %p3780_p7 }
0x1061   :  { %3788 = shalt.err (!%p3785_p9)
}
0x1062   :  { %2606 = dma.vmem_to_hbm [thread:$0]  %s2601_s22, 512, %s4572_s16, [#allocation4], %s3796_s0, %s3796_s0, %s3797_s17  }
0x1063   :  { %3793 = dma.done.wait [#allocation4], 512  }
0x1064   :  { %3794 = vsyncadd [#allocation4], 4294966784 }
0x1065   :  { %2610 = vsyncpa [#allocation3], 1 }
0x1066   :  { %2611 = vsyncpa [#allocation6], 1 }
0x1067   :  { %2612 = vsyncpa [#allocation4], 1 }

</bundles_post_ra>
